<compile_context>
chip_gen: v7x
topology: tpu7x:2x2x1
jax: 0.10.0
libtpu: 0.0.40
codegen_flags: <defaults>
</compile_context>

<pallas_src>
import functools
import math

import jax
import jax.numpy as jnp
from jax import lax
from jax.experimental import pallas as pl
from jax.experimental.pallas import tpu as pltpu


def _round_up(x, m):
    return (x + m - 1) // m * m


# ------------------------------ fused kernel --------------------------------

def _bottleneck_kernel(x_ref, w1_ref, w2_ref, w3_ref, b1_ref, b2_ref, b3_ref,
                       o_ref, *, planes, packed):
    """Fused bottleneck forward for one image.

    x_ref  : (1, H, W, Cin)  bf16 (channels zero-padded to a 128 multiple)
    w1_ref : (Cin, Pp)       bf16 (BN1 scale folded into columns)
    w2_ref : packed  -> (Pp, Pp)     rows = tap*planes + ci   (BN2 folded)
             generic -> (9, Pp, Pp)  taps dy*3+dx             (BN2 folded)
    w3_ref : (Pp, Cout)      bf16 (BN3 scale folded in)
    b*_ref : (1, C)          f32  BN biases
    o_ref  : (1, H, W, Cout) f32
    """
    _, H, W, Cin = x_ref.shape
    Pp = w1_ref.shape[1]
    Cout = w3_ref.shape[1]
    HW = H * W

    # ---- conv1 (1x1) + bn1 + relu  (bf16 operands, f32 accumulate) ----------
    x_bf = x_ref[0].reshape(HW, Cin)
    h1 = jnp.dot(x_bf, w1_ref[...], preferred_element_type=jnp.float32)
    h1 = jnp.maximum(h1 + b1_ref[...], 0.0)          # padded cols stay exactly 0

    # ---- 3x3 tap generation: XLU rolls + boundary masks ---------------------
    # (no sublane-unaligned slices, no halo scratch)
    rr = lax.broadcasted_iota(jnp.int32, (HW, Pp), 0)                    # flat row
    xx = lax.broadcasted_iota(jnp.int32, (H, W, Pp), 1).reshape(HW, Pp)  # x coord

    def tap(dy, dx):
        """h1 of the (dy,dx) neighbour for every output pixel (zero outside)."""
        s = (dy - 1) * W + (dx - 1)
        t = h1 if s == 0 else pltpu.roll(h1, (-s) % HW, axis=0)
        conds = []
        if dy == 0:
            conds.append(rr >= W)
        if dy == 2:
            conds.append(rr < (H - 1) * W)
        if dx == 0:
            conds.append(xx >= 1)
        if dx == 2:
            conds.append(xx <= W - 2)
        if not conds:
            return t
        m = conds[0]
        for c in conds[1:]:
            m = m & c
        return jnp.where(m, t, 0.0)

    # ---- conv2 (3x3, pad 1) + bn2 + relu ------------------------------------
    if packed:
        # Pack all 9 taps along the contraction dim: column block t holds tap
        # t's `planes` channels (placed by a lane roll of the zero-padded h1),
        # so conv2 is ONE matmul instead of nine K=128-padded ones.
        pk = None
        for dy in range(3):
            for dx in range(3):
                t_idx = dy * 3 + dx
                v = tap(dy, dx)
                if t_idx:
                    v = pltpu.roll(v, t_idx * planes, axis=1)
                pk = v if pk is None else pk + v
        h2 = jnp.dot(pk.astype(jnp.bfloat16), w2_ref[...],
                     preferred_element_type=jnp.float32)
    else:
        # Generic path: taps first, then an uninterrupted chain of accumulating
        # dots; the first dot initializes the accumulator (no zeros + add).
        taps = [tap(dy, dx).astype(jnp.bfloat16)
                for dy in range(3) for dx in range(3)]
        h2 = jnp.dot(taps[0], w2_ref[0], preferred_element_type=jnp.float32)
        for t_idx in range(1, 9):
            h2 = h2 + jnp.dot(taps[t_idx], w2_ref[t_idx],
                              preferred_element_type=jnp.float32)
    h2 = jnp.maximum(h2 + b2_ref[...], 0.0)

    # ---- conv3 (1x1) + bn3 + identity residual + relu -----------------------
    y = jnp.dot(h2.astype(jnp.bfloat16), w3_ref[...],
                preferred_element_type=jnp.float32)
    res = x_ref[0].reshape(HW, Cout).astype(jnp.float32)   # re-read: short live range
    y = jnp.maximum(y + b3_ref[...] + res, 0.0)
    o_ref[0] = y.reshape(H, W, Cout).astype(o_ref.dtype)


# ------------------------------ module forward ------------------------------

def bottleneck_forward(x_nchw, params, eps=1e-5):
    """Pallas implementation of Bottleneck.forward (stride=1, downsample=None)."""
    N, Cin, H, W = x_nchw.shape
    planes = params["w1"].shape[0]                    # conv1: (planes, Cin, 1, 1)
    out_ch = params["w3"].shape[0]                    # conv3: (4*planes, planes, 1, 1)
    assert out_ch == Cin, "identity residual requires Cin == 4*planes"
    # TODO(synk): stride>1 / downsample path not implemented.

    LANE = 128
    Cp = _round_up(Cin, LANE)
    Pp = _round_up(planes, LANE)
    Op = _round_up(out_ch, LANE)
    packed = 9 * planes <= LANE           # pack taps along K (mini im2col)

    # NHWC, pad channels, bf16 input (halves input HBM bytes; residual add is
    # still done in f32 inside the kernel).
    x = jnp.transpose(x_nchw, (0, 2, 3, 1))
    if Cp != Cin:
        x = jnp.pad(x, ((0, 0), (0, 0), (0, 0), (0, Cp - Cin)))
    x = x.astype(jnp.bfloat16)

    def fold(w_oihw, bn):
        # Fold BN (inference) into conv: scale into weight columns, bias stays
        # as a single per-channel add in the kernel epilogue.
        gamma, beta, mean, var = bn
        scale = gamma / jnp.sqrt(var + eps)
        bias = beta - mean * scale
        w = jnp.transpose(w_oihw, (2, 3, 1, 0)) * scale     # (kh, kw, ci, co)
        return w, bias

    def pad2(m, rows, cols):
        r, c = m.shape
        return jnp.pad(m, ((0, rows - r), (0, cols - c))).astype(jnp.bfloat16)

    def padb(b, cols):
        return jnp.pad(b, (0, cols - b.shape[0])).reshape(1, cols).astype(jnp.float32)

    w1f, b1 = fold(params["w1"], params["bn1"])
    w2f, b2 = fold(params["w2"], params["bn2"])
    w3f, b3 = fold(params["w3"], params["bn3"])

    w1 = pad2(w1f.reshape(Cin, planes), Cp, Pp)
    w3 = pad2(w3f.reshape(planes, out_ch), Pp, Op)
    if packed:
        # rows ordered (tap-major, ci-minor): row = tap*planes + ci
        w2 = pad2(w2f.reshape(9 * planes, planes), Pp, Pp)
        w2_spec = pl.BlockSpec((Pp, Pp), lambda n: (0, 0))
    else:
        w2 = jnp.pad(w2f, ((0, 0), (0, 0), (0, Pp - planes), (0, Pp - planes)))
        w2 = w2.reshape(9, Pp, Pp).astype(jnp.bfloat16)
        w2_spec = pl.BlockSpec((9, Pp, Pp), lambda n: (0, 0, 0))
    b1p, b2p, b3p = padb(b1, Pp), padb(b2, Pp), padb(b3, Op)

    # VMEM budget from actual block sizes (x2 double buffering) + headroom for
    # the in-kernel chained values; capped so it also fits v7x's 64 MiB VMEM.
    def nbytes(a):
        return math.prod(a.shape) * jnp.dtype(a.dtype).itemsize
    io_bytes = (H * W * Cp * 2 + H * W * Op * 4       # x block (bf16), out block (f32)
                + nbytes(w1) + nbytes(w2) + nbytes(w3)
                + nbytes(b1p) + nbytes(b2p) + nbytes(b3p))
    vmem_limit = int(min(48 * 2**20, 2 * io_bytes + 12 * 2**20))

    kernel = functools.partial(_bottleneck_kernel, planes=planes, packed=packed)
    out = pl.pallas_call(
        kernel,
        out_shape=jax.ShapeDtypeStruct((N, H, W, Op), x_nchw.dtype),
        grid=(N,),
        in_specs=[
            pl.BlockSpec((1, H, W, Cp), lambda n: (n, 0, 0, 0)),
            pl.BlockSpec((Cp, Pp), lambda n: (0, 0)),    # constant in n -> no re-DMA
            w2_spec,
            pl.BlockSpec((Pp, Op), lambda n: (0, 0)),
            pl.BlockSpec((1, Pp), lambda n: (0, 0)),
            pl.BlockSpec((1, Pp), lambda n: (0, 0)),
            pl.BlockSpec((1, Op), lambda n: (0, 0)),
        ],
        out_specs=pl.BlockSpec((1, H, W, Op), lambda n: (n, 0, 0, 0)),
        compiler_params=pltpu.CompilerParams(
            dimension_semantics=("parallel",),
            vmem_limit_bytes=vmem_limit,
        ),
    )(x, w1, w2, w3, b1p, b2p, b3p)

    out = out[..., :out_ch]                            # drop channel padding
    return jnp.transpose(out, (0, 3, 1, 2))            # NHWC -> NCHW


# ----------------------------- pure-JAX reference ---------------------------

def bottleneck_reference(x_nchw, params):
    x = jnp.transpose(x_nchw, (0, 2, 3, 1))

    def conv(h, w_oihw, pad=0):
        w = jnp.transpose(w_oihw, (2, 3, 1, 0))  # OIHW -> HWIO
        return lax.conv_general_dilated(
            h, w, (1, 1), [(pad, pad), (pad, pad)],
            dimension_numbers=("NHWC", "HWIO", "NHWC"),
        )

    def bn(h, stats, eps=1e-5):
        gamma, beta, mean, var = stats
        return (h - mean) / jnp.sqrt(var + eps) * gamma + beta

    out = jax.nn.relu(bn(conv(x, params["w1"]), params["bn1"]))
    out = jax.nn.relu(bn(conv(out, params["w2"], pad=1), params["bn2"]))
    out = bn(conv(out, params["w3"]), params["bn3"])
    out = jax.nn.relu(out + x)
    return jnp.transpose(out, (0, 3, 1, 2))


# --------------------------------- main --------------------------------------

if __name__ == "__main__":
    key = jax.random.PRNGKey(0)
    N, inplanes, H, W = 2, 16, 16, 16
    planes = 4                   # expansion*planes == inplanes -> identity residual

    ks = jax.random.split(key, 8)

    def bn_stats(k, c):
        k1, k2, k3, k4 = jax.random.split(k, 4)
        gamma = 1.0 + 0.1 * jax.random.normal(k1, (c,), jnp.float32)
        beta = 0.1 * jax.random.normal(k2, (c,), jnp.float32)
        mean = 0.1 * jax.random.normal(k3, (c,), jnp.float32)
        var = jax.random.uniform(k4, (c,), jnp.float32, 0.5, 1.5)
        return (gamma, beta, mean, var)

    params = {
        "w1": 0.2 * jax.random.normal(ks[0], (planes, inplanes, 1, 1), jnp.float32),
        "w2": 0.2 * jax.random.normal(ks[1], (planes, planes, 3, 3), jnp.float32),
        "w3": 0.2 * jax.random.normal(ks[2], (planes * 4, planes, 1, 1), jnp.float32),
        "bn1": bn_stats(ks[3], planes),
        "bn2": bn_stats(ks[4], planes),
        "bn3": bn_stats(ks[5], planes * 4),
    }

    x = jax.random.normal(ks[6], (N, inplanes, H, W), jnp.float32)

    fwd = jax.jit(bottleneck_forward)
    out = jax.block_until_ready(fwd(x, params))

    ref = bottleneck_reference(x, params)
    assert out.shape == ref.shape == (N, planes * 4, H, W), (out.shape, ref.shape)
    max_err = float(jnp.max(jnp.abs(out - ref)))
    # bf16 operands / bf16 input (inference-style); loose-but-meaningful tolerance.
    assert jnp.allclose(out, ref, atol=3e-2, rtol=3e-2), max_err

    print("KERNEL_OK")
</pallas_src>

<mosaic_0001>
module attributes {stable_mosaic.version = 11 : i64} {
  func.func @_bottleneck_kernel(%arg0: i32, %arg1: memref<1x16x16x128xbf16, #tpu.memory_space<vmem>>, %arg2: memref<128x128xbf16, #tpu.memory_space<vmem>>, %arg3: memref<128x128xbf16, #tpu.memory_space<vmem>>, %arg4: memref<128x128xbf16, #tpu.memory_space<vmem>>, %arg5: memref<1x128xf32, #tpu.memory_space<vmem>>, %arg6: memref<1x128xf32, #tpu.memory_space<vmem>>, %arg7: memref<1x128xf32, #tpu.memory_space<vmem>>, %arg8: memref<1x16x16x128xf32, #tpu.memory_space<vmem>>) attributes {dimension_semantics = [#tpu.dimension_semantics<parallel>], iteration_bounds = array<i64: 2>, scalar_prefetch = 0 : i64, scratch_operands = 0 : i64, tpu.core_type = #tpu.core_type<tc>, window_params = [{transform_indices = @transform_0, window_bounds = array<i64: 1, 16, 16, 128>}, {pipeline_mode = #tpu.pipeline_mode<synchronous>, transform_indices = @transform_1, window_bounds = array<i64: 128, 128>}, {pipeline_mode = #tpu.pipeline_mode<synchronous>, transform_indices = @transform_2, window_bounds = array<i64: 128, 128>}, {pipeline_mode = #tpu.pipeline_mode<synchronous>, transform_indices = @transform_3, window_bounds = array<i64: 128, 128>}, {pipeline_mode = #tpu.pipeline_mode<synchronous>, transform_indices = @transform_4, window_bounds = array<i64: 1, 128>}, {pipeline_mode = #tpu.pipeline_mode<synchronous>, transform_indices = @transform_5, window_bounds = array<i64: 1, 128>}, {pipeline_mode = #tpu.pipeline_mode<synchronous>, transform_indices = @transform_6, window_bounds = array<i64: 1, 128>}, {transform_indices = @transform_7, window_bounds = array<i64: 1, 16, 16, 128>}]} {
    %c0 = arith.constant 0 : index
    %c0_0 = arith.constant 0 : index
    %c0_1 = arith.constant 0 : index
    %c0_2 = arith.constant 0 : index
    %0 = vector.load %arg1[%c0, %c0_0, %c0_1, %c0_2] : memref<1x16x16x128xbf16, #tpu.memory_space<vmem>>, vector<1x16x16x128xbf16>
    %1 = vector.shape_cast %0 : vector<1x16x16x128xbf16> to vector<16x16x128xbf16>
    %2 = vector.shape_cast %1 : vector<16x16x128xbf16> to vector<256x128xbf16>
    %c0_3 = arith.constant 0 : index
    %c0_4 = arith.constant 0 : index
    %3 = vector.load %arg2[%c0_3, %c0_4] : memref<128x128xbf16, #tpu.memory_space<vmem>>, vector<128x128xbf16>
    %cst = arith.constant dense<0.000000e+00> : vector<256x128xf32>
    %4 = tpu.matmul %2, %3, %cst {dimension_numbers = #tpu.dot_dimension_numbers<[1], [0], [0], [1], [0, 0, 1, 1], [], []>} : vector<256x128xbf16>, vector<128x128xbf16>, vector<256x128xf32> -> vector<256x128xf32>
    %c0_5 = arith.constant 0 : index
    %c0_6 = arith.constant 0 : index
    %5 = vector.load %arg5[%c0_5, %c0_6] : memref<1x128xf32, #tpu.memory_space<vmem>>, vector<1x128xf32>
    %6 = vector.broadcast %5 : vector<1x128xf32> to vector<256x128xf32>
    %7 = arith.addf %4, %6 : vector<256x128xf32>
    %cst_7 = arith.constant 0.000000e+00 : f32
    %8 = vector.broadcast %cst_7 : f32 to vector<256x128xf32>
    %9 = arith.maximumf %7, %8 : vector<256x128xf32>
    %10 = tpu.iota {dimensions = array<i32: 0>} : vector<256x128xi32>
    %11 = tpu.iota {dimensions = array<i32: 1>} : vector<16x16x128xi32>
    %12 = vector.shape_cast %11 : vector<16x16x128xi32> to vector<256x128xi32>
    %c17_i32 = arith.constant 17 : i32
    %13 = tpu.dynamic_rotate %9 by %c17_i32 dim 0 : vector<256x128xf32>, i32 -> vector<256x128xf32>
    %c16_i32 = arith.constant 16 : i32
    %14 = vector.broadcast %c16_i32 : i32 to vector<256x128xi32>
    %15 = arith.cmpi sge, %10, %14 : vector<256x128xi32>
    %c1_i32 = arith.constant 1 : i32
    %16 = vector.broadcast %c1_i32 : i32 to vector<256x128xi32>
    %17 = arith.cmpi sge, %12, %16 : vector<256x128xi32>
    %18 = arith.andi %15, %17 : vector<256x128xi1>
    %cst_8 = arith.constant 0.000000e+00 : f32
    %19 = vector.broadcast %cst_8 : f32 to vector<256x128xf32>
    %20 = arith.select %18, %13, %19 : vector<256x128xi1>, vector<256x128xf32>
    %c16_i32_9 = arith.constant 16 : i32
    %21 = tpu.dynamic_rotate %9 by %c16_i32_9 dim 0 : vector<256x128xf32>, i32 -> vector<256x128xf32>
    %c16_i32_10 = arith.constant 16 : i32
    %22 = vector.broadcast %c16_i32_10 : i32 to vector<256x128xi32>
    %23 = arith.cmpi sge, %10, %22 : vector<256x128xi32>
    %cst_11 = arith.constant 0.000000e+00 : f32
    %24 = vector.broadcast %cst_11 : f32 to vector<256x128xf32>
    %25 = arith.select %23, %21, %24 : vector<256x128xi1>, vector<256x128xf32>
    %c4_i32 = arith.constant 4 : i32
    %26 = tpu.dynamic_rotate %25 by %c4_i32 dim 1 : vector<256x128xf32>, i32 -> vector<256x128xf32>
    %27 = arith.addf %20, %26 : vector<256x128xf32>
    %c15_i32 = arith.constant 15 : i32
    %28 = tpu.dynamic_rotate %9 by %c15_i32 dim 0 : vector<256x128xf32>, i32 -> vector<256x128xf32>
    %c16_i32_12 = arith.constant 16 : i32
    %29 = vector.broadcast %c16_i32_12 : i32 to vector<256x128xi32>
    %30 = arith.cmpi sge, %10, %29 : vector<256x128xi32>
    %c14_i32 = arith.constant 14 : i32
    %31 = vector.broadcast %c14_i32 : i32 to vector<256x128xi32>
    %32 = arith.cmpi sle, %12, %31 : vector<256x128xi32>
    %33 = arith.andi %30, %32 : vector<256x128xi1>
    %cst_13 = arith.constant 0.000000e+00 : f32
    %34 = vector.broadcast %cst_13 : f32 to vector<256x128xf32>
    %35 = arith.select %33, %28, %34 : vector<256x128xi1>, vector<256x128xf32>
    %c8_i32 = arith.constant 8 : i32
    %36 = tpu.dynamic_rotate %35 by %c8_i32 dim 1 : vector<256x128xf32>, i32 -> vector<256x128xf32>
    %37 = arith.addf %27, %36 : vector<256x128xf32>
    %c1_i32_14 = arith.constant 1 : i32
    %38 = tpu.dynamic_rotate %9 by %c1_i32_14 dim 0 : vector<256x128xf32>, i32 -> vector<256x128xf32>
    %c1_i32_15 = arith.constant 1 : i32
    %39 = vector.broadcast %c1_i32_15 : i32 to vector<256x128xi32>
    %40 = arith.cmpi sge, %12, %39 : vector<256x128xi32>
    %cst_16 = arith.constant 0.000000e+00 : f32
    %41 = vector.broadcast %cst_16 : f32 to vector<256x128xf32>
    %42 = arith.select %40, %38, %41 : vector<256x128xi1>, vector<256x128xf32>
    %c12_i32 = arith.constant 12 : i32
    %43 = tpu.dynamic_rotate %42 by %c12_i32 dim 1 : vector<256x128xf32>, i32 -> vector<256x128xf32>
    %44 = arith.addf %37, %43 : vector<256x128xf32>
    %c16_i32_17 = arith.constant 16 : i32
    %45 = tpu.dynamic_rotate %9 by %c16_i32_17 dim 1 : vector<256x128xf32>, i32 -> vector<256x128xf32>
    %46 = arith.addf %44, %45 : vector<256x128xf32>
    %c255_i32 = arith.constant 255 : i32
    %47 = tpu.dynamic_rotate %9 by %c255_i32 dim 0 : vector<256x128xf32>, i32 -> vector<256x128xf32>
    %c14_i32_18 = arith.constant 14 : i32
    %48 = vector.broadcast %c14_i32_18 : i32 to vector<256x128xi32>
    %49 = arith.cmpi sle, %12, %48 : vector<256x128xi32>
    %cst_19 = arith.constant 0.000000e+00 : f32
    %50 = vector.broadcast %cst_19 : f32 to vector<256x128xf32>
    %51 = arith.select %49, %47, %50 : vector<256x128xi1>, vector<256x128xf32>
    %c20_i32 = arith.constant 20 : i32
    %52 = tpu.dynamic_rotate %51 by %c20_i32 dim 1 : vector<256x128xf32>, i32 -> vector<256x128xf32>
    %53 = arith.addf %46, %52 : vector<256x128xf32>
    %c241_i32 = arith.constant 241 : i32
    %54 = tpu.dynamic_rotate %9 by %c241_i32 dim 0 : vector<256x128xf32>, i32 -> vector<256x128xf32>
    %c240_i32 = arith.constant 240 : i32
    %55 = vector.broadcast %c240_i32 : i32 to vector<256x128xi32>
    %56 = arith.cmpi slt, %10, %55 : vector<256x128xi32>
    %c1_i32_20 = arith.constant 1 : i32
    %57 = vector.broadcast %c1_i32_20 : i32 to vector<256x128xi32>
    %58 = arith.cmpi sge, %12, %57 : vector<256x128xi32>
    %59 = arith.andi %56, %58 : vector<256x128xi1>
    %cst_21 = arith.constant 0.000000e+00 : f32
    %60 = vector.broadcast %cst_21 : f32 to vector<256x128xf32>
    %61 = arith.select %59, %54, %60 : vector<256x128xi1>, vector<256x128xf32>
    %c24_i32 = arith.constant 24 : i32
    %62 = tpu.dynamic_rotate %61 by %c24_i32 dim 1 : vector<256x128xf32>, i32 -> vector<256x128xf32>
    %63 = arith.addf %53, %62 : vector<256x128xf32>
    %c240_i32_22 = arith.constant 240 : i32
    %64 = tpu.dynamic_rotate %9 by %c240_i32_22 dim 0 : vector<256x128xf32>, i32 -> vector<256x128xf32>
    %c240_i32_23 = arith.constant 240 : i32
    %65 = vector.broadcast %c240_i32_23 : i32 to vector<256x128xi32>
    %66 = arith.cmpi slt, %10, %65 : vector<256x128xi32>
    %cst_24 = arith.constant 0.000000e+00 : f32
    %67 = vector.broadcast %cst_24 : f32 to vector<256x128xf32>
    %68 = arith.select %66, %64, %67 : vector<256x128xi1>, vector<256x128xf32>
    %c28_i32 = arith.constant 28 : i32
    %69 = tpu.dynamic_rotate %68 by %c28_i32 dim 1 : vector<256x128xf32>, i32 -> vector<256x128xf32>
    %70 = arith.addf %63, %69 : vector<256x128xf32>
    %c239_i32 = arith.constant 239 : i32
    %71 = tpu.dynamic_rotate %9 by %c239_i32 dim 0 : vector<256x128xf32>, i32 -> vector<256x128xf32>
    %c240_i32_25 = arith.constant 240 : i32
    %72 = vector.broadcast %c240_i32_25 : i32 to vector<256x128xi32>
    %73 = arith.cmpi slt, %10, %72 : vector<256x128xi32>
    %c14_i32_26 = arith.constant 14 : i32
    %74 = vector.broadcast %c14_i32_26 : i32 to vector<256x128xi32>
    %75 = arith.cmpi sle, %12, %74 : vector<256x128xi32>
    %76 = arith.andi %73, %75 : vector<256x128xi1>
    %cst_27 = arith.constant 0.000000e+00 : f32
    %77 = vector.broadcast %cst_27 : f32 to vector<256x128xf32>
    %78 = arith.select %76, %71, %77 : vector<256x128xi1>, vector<256x128xf32>
    %c32_i32 = arith.constant 32 : i32
    %79 = tpu.dynamic_rotate %78 by %c32_i32 dim 1 : vector<256x128xf32>, i32 -> vector<256x128xf32>
    %80 = arith.addf %70, %79 : vector<256x128xf32>
    %81 = arith.truncf %80 : vector<256x128xf32> to vector<256x128xbf16>
    %c0_28 = arith.constant 0 : index
    %c0_29 = arith.constant 0 : index
    %82 = vector.load %arg3[%c0_28, %c0_29] : memref<128x128xbf16, #tpu.memory_space<vmem>>, vector<128x128xbf16>
    %cst_30 = arith.constant dense<0.000000e+00> : vector<256x128xf32>
    %83 = tpu.matmul %81, %82, %cst_30 {dimension_numbers = #tpu.dot_dimension_numbers<[1], [0], [0], [1], [0, 0, 1, 1], [], []>} : vector<256x128xbf16>, vector<128x128xbf16>, vector<256x128xf32> -> vector<256x128xf32>
    %c0_31 = arith.constant 0 : index
    %c0_32 = arith.constant 0 : index
    %84 = vector.load %arg6[%c0_31, %c0_32] : memref<1x128xf32, #tpu.memory_space<vmem>>, vector<1x128xf32>
    %85 = vector.broadcast %84 : vector<1x128xf32> to vector<256x128xf32>
    %86 = arith.addf %83, %85 : vector<256x128xf32>
    %cst_33 = arith.constant 0.000000e+00 : f32
    %87 = vector.broadcast %cst_33 : f32 to vector<256x128xf32>
    %88 = arith.maximumf %86, %87 : vector<256x128xf32>
    %89 = arith.truncf %88 : vector<256x128xf32> to vector<256x128xbf16>
    %c0_34 = arith.constant 0 : index
    %c0_35 = arith.constant 0 : index
    %90 = vector.load %arg4[%c0_34, %c0_35] : memref<128x128xbf16, #tpu.memory_space<vmem>>, vector<128x128xbf16>
    %cst_36 = arith.constant dense<0.000000e+00> : vector<256x128xf32>
    %91 = tpu.matmul %89, %90, %cst_36 {dimension_numbers = #tpu.dot_dimension_numbers<[1], [0], [0], [1], [0, 0, 1, 1], [], []>} : vector<256x128xbf16>, vector<128x128xbf16>, vector<256x128xf32> -> vector<256x128xf32>
    %c0_37 = arith.constant 0 : index
    %c0_38 = arith.constant 0 : index
    %c0_39 = arith.constant 0 : index
    %c0_40 = arith.constant 0 : index
    %92 = vector.load %arg1[%c0_37, %c0_38, %c0_39, %c0_40] : memref<1x16x16x128xbf16, #tpu.memory_space<vmem>>, vector<1x16x16x128xbf16>
    %93 = vector.shape_cast %92 : vector<1x16x16x128xbf16> to vector<16x16x128xbf16>
    %94 = vector.shape_cast %93 : vector<16x16x128xbf16> to vector<256x128xbf16>
    %95 = arith.extf %94 : vector<256x128xbf16> to vector<256x128xf32>
    %c0_41 = arith.constant 0 : index
    %c0_42 = arith.constant 0 : index
    %96 = vector.load %arg7[%c0_41, %c0_42] : memref<1x128xf32, #tpu.memory_space<vmem>>, vector<1x128xf32>
    %97 = vector.broadcast %96 : vector<1x128xf32> to vector<256x128xf32>
    %98 = arith.addf %91, %97 : vector<256x128xf32>
    %99 = arith.addf %98, %95 : vector<256x128xf32>
    %cst_43 = arith.constant 0.000000e+00 : f32
    %100 = vector.broadcast %cst_43 : f32 to vector<256x128xf32>
    %101 = arith.maximumf %99, %100 : vector<256x128xf32>
    %102 = vector.shape_cast %101 : vector<256x128xf32> to vector<16x16x128xf32>
    %c0_44 = arith.constant 0 : index
    %c0_45 = arith.constant 0 : index
    %c0_46 = arith.constant 0 : index
    %c0_47 = arith.constant 0 : index
    %103 = vector.load %arg8[%c0_44, %c0_45, %c0_46, %c0_47] : memref<1x16x16x128xf32, #tpu.memory_space<vmem>>, vector<1x16x16x128xf32>
    %104 = vector.shape_cast %103 : vector<1x16x16x128xf32> to vector<16x16x128xf32>
    %105 = vector.shape_cast %102 : vector<16x16x128xf32> to vector<1x16x16x128xf32>
    tpu.vector_store %arg8[%c0_44, %c0_45, %c0_46, %c0_47], %105 {strides = array<i32>} : memref<1x16x16x128xf32, #tpu.memory_space<vmem>>, vector<1x16x16x128xf32>,
    return
  }
  func.func @transform_0(%arg0: i32) -> (i32, i32, i32, i32) {
    %c0_i32 = arith.constant 0 : i32
    %c0_i32_0 = arith.constant 0 : i32
    %c0_i32_1 = arith.constant 0 : i32
    %c0_i32_2 = arith.constant 0 : i32
    return %arg0, %c0_i32, %c0_i32_0, %c0_i32_1 : i32, i32, i32, i32
  }
  func.func @transform_1(%arg0: i32) -> (i32, i32) {
    %c0_i32 = arith.constant 0 : i32
    %c0_i32_0 = arith.constant 0 : i32
    %c0_i32_1 = arith.constant 0 : i32
    return %c0_i32, %c0_i32_0 : i32, i32
  }
  func.func @transform_2(%arg0: i32) -> (i32, i32) {
    %c0_i32 = arith.constant 0 : i32
    %c0_i32_0 = arith.constant 0 : i32
    %c0_i32_1 = arith.constant 0 : i32
    return %c0_i32, %c0_i32_0 : i32, i32
  }
  func.func @transform_3(%arg0: i32) -> (i32, i32) {
    %c0_i32 = arith.constant 0 : i32
    %c0_i32_0 = arith.constant 0 : i32
    %c0_i32_1 = arith.constant 0 : i32
    return %c0_i32, %c0_i32_0 : i32, i32
  }
  func.func @transform_4(%arg0: i32) -> (i32, i32) {
    %c0_i32 = arith.constant 0 : i32
    %c0_i32_0 = arith.constant 0 : i32
    %c0_i32_1 = arith.constant 0 : i32
    return %c0_i32, %c0_i32_0 : i32, i32
  }
  func.func @transform_5(%arg0: i32) -> (i32, i32) {
    %c0_i32 = arith.constant 0 : i32
    %c0_i32_0 = arith.constant 0 : i32
    %c0_i32_1 = arith.constant 0 : i32
    return %c0_i32, %c0_i32_0 : i32, i32
  }
  func.func @transform_6(%arg0: i32) -> (i32, i32) {
    %c0_i32 = arith.constant 0 : i32
    %c0_i32_0 = arith.constant 0 : i32
    %c0_i32_1 = arith.constant 0 : i32
    return %c0_i32, %c0_i32_0 : i32, i32
  }
  func.func @transform_7(%arg0: i32) -> (i32, i32, i32, i32) {
    %c0_i32 = arith.constant 0 : i32
    %c0_i32_0 = arith.constant 0 : i32
    %c0_i32_1 = arith.constant 0 : i32
    %c0_i32_2 = arith.constant 0 : i32
    return %arg0, %c0_i32, %c0_i32_0, %c0_i32_1 : i32, i32, i32, i32
  }
}

</mosaic_0001>

<bundles_post_ra>
// kernel: bottleneck_forward.1
= control target key start
LH: loop header
LB: loop body
LE: loop exit
PB: predicated region body
PF: predicated region fallthrough
CT: control target
= control target key end

     0   :  { %s3234_s24 = smov 0   ;;  %s5163_s0 = inlined_call_operand.vmem [shape: bf16[2,16,16,128], index: 0, kind: input, shape index: {}]   ;;  %s5164_s1 = inlined_call_operand.vmem [shape: bf16[128,128], index: 1, kind: input, shape index: {}]   ;;  %s5165_s2 = inlined_call_operand.vmem [shape: bf16[128,128], index: 2, kind: input, shape index: {}]   ;;  %s5166_s3 = inlined_call_operand.vmem [shape: bf16[128,128], index: 3, kind: input, shape index: {}]   ;;  %s5167_s4 = inlined_call_operand.vmem [shape: f32[1,128], index: 4, kind: input, shape index: {}]   ;;  %s5168_s5 = inlined_call_operand.vmem [shape: f32[1,128], index: 5, kind: input, shape index: {}]   ;;  %s5169_s6 = inlined_call_operand.vmem [shape: f32[1,128], index: 6, kind: input, shape index: {}]   ;;  %s5170_s7 = inlined_call_operand.vmem [shape: f32[2,16,16,128], index: 7, kind: output, shape index: {}]  }
   0x1 LB: > { %s2766_s25 = sadd.s32 4294967295, %s3183_s24   ;;  %p2770_p0 = scmp.ge.s32.totalorder %s3183_s24, 1  ;;  %s3183_s24 = sphi %s3234_s24, %s17_s24  }
   0x2   : > { %p237_p1 = scmp.lt.s32.totalorder %s3183_s24, 3 }
   0x4   : > { %p238_p2 = pnand %p2770_p0, %p237_p1 }
   0x6   : > { %241 = sbr.rel (%p238_p2) target bundleno = 1325 (0x52d), region = 48 }
   0xd   : > { %v3096_v0 = vld [vmem:[%s5164_s1] sm:$0xff]   ;;  %p269_p3 = scmp.lt.s32.totalorder %s2766_s25, 1  ;;  %v3097_v1 = vld [vmem:[%s5164_s1 + $0x8] sm:$0xff]   ;;  %v3098_v2 = vld [vmem:[%s5164_s1 + $0x10] sm:$0xff]   ;;  %v5171_v3 = vmov 0.0   ;;  %s3186_s13 = smov 4   ;;  %v672_v26 = vlaneseq }
   0xe   : > { %2894 = vmatprep.subr.bf16.mxu0 %v3096_v0  ;;  %3038 = vmatprep.subr.bf16.mxu1 %v3096_v0  ;;  %v3099_v4 = vld [vmem:[%s5164_s1 + $0x18] sm:$0xff]   ;;  %v3100_v7 = vld [vmem:[%s5164_s1 + $0x20] sm:$0xff]   ;;  %v3101_v8 = vld [vmem:[%s5164_s1 + $0x28] sm:$0xff]   ;;  %s3187_s26 = smov 8   ;;  %s3188_s29 = smov 16  }
   0xf   : > { %s5500_s25 = smov (!%p269_p3, %s2766_s25), 1  ;;  %2895 = vmatpush3.bf16.msra.mxu0 %v3096_v0  ;;  %3046 = vmatpush3.bf16.msra.mxu1 %v3096_v0  ;;  %v3102_v9 = vld [vmem:[%s5164_s1 + $0x30] sm:$0xff]   ;;  %v3103_v10 = vld [vmem:[%s5164_s1 + $0x38] sm:$0xff]   ;;  %v3297_v25 = vld [vmem:[%s5167_s4] ss:$0 sm:$0xff]  ;;  %v3302_v36 = vshrl.u32 %v672_v26, 7 }
  0x10   : > { %2896 = vmatprep.subr.bf16.mxu0 %v3097_v1  ;;  %3039 = vmatprep.subr.bf16.mxu1 %v3097_v1  ;;  %s2820_s9 = sshll.u32 %s5500_s25, 7  ;;  %s3189_s30 = smov 28  }
  0x11   : > { %s3257_s12 = scalar_lea.vmem %s5163_s0, %s2820_s9  ;;  %3072 = vrot.lane.b32.xlu1 %v5171_v3, %s3186_s13  ;;  %vm737_vm0 = vcmp.lt.s32.totalorder %v3302_v36, 1  ;;  %vm1028_vm1 = vcmp.lt.s32.totalorder %v3302_v36, 7  ;;  %s3190_s8 = smov 12   ;;  %vm802_vm3 = vcmp.ge.s32.totalorder %v3302_v36, 1 }
  0x12   : > { %v280_v5 = vld [vmem:[%s3257_s12] sm:$0xff]   ;;  %v282_v11 = vld [vmem:[%s3257_s12 + $0x8] sm:$0xff]   ;;  %v284_v13 = vld [vmem:[%s3257_s12 + $0x10] sm:$0xff]   ;;  %s3191_s9 = smov 24   ;;  %s3192_s10 = smov 20  }
  0x13   : > { %2897 = vmatpush3.bf16.msra.mxu0 %v3097_v1  ;;  %3047 = vmatpush3.bf16.msra.mxu1 %v3097_v1  ;;  %v296_v6 = vld [vmem:[%s3257_s12 + $0x40] sm:$0xff]   ;;  %v298_v12 = vld [vmem:[%s3257_s12 + $0x48] sm:$0xff]   ;;  %v300_v14 = vld [vmem:[%s3257_s12 + $0x50] sm:$0xff]   ;;  %s3193_s11 = smov 32  }
  0x14   : > { %2898 = vmatprep.subr.bf16.mxu0 %v3098_v2  ;;  %3040 = vmatprep.subr.bf16.mxu1 %v3098_v2  ;;  %v286_v15 = vld [vmem:[%s3257_s12 + $0x18] sm:$0xff]   ;;  %v288_v17 = vld [vmem:[%s3257_s12 + $0x20] sm:$0xff]   ;;  %v290_v19 = vld [vmem:[%s3257_s12 + $0x28] sm:$0xff]  }
  0x15   : > { %2910 = vmatprep.mubr.bf16.mxu0 %v280_v5  ;;  %2926 = vmatprep.mubr.bf16.mxu1 %v296_v6  ;;  %v302_v16 = vld [vmem:[%s3257_s12 + $0x58] sm:$0xff]   ;;  %v304_v18 = vld [vmem:[%s3257_s12 + $0x60] sm:$0xff]   ;;  %v306_v20 = vld [vmem:[%s3257_s12 + $0x68] sm:$0xff]  }
  0x16   : > { %v292_v21 = vld [vmem:[%s3257_s12 + $0x30] sm:$0xff]   ;;  %v294_v23 = vld [vmem:[%s3257_s12 + $0x38] sm:$0xff]   ;;  %3077 = vrot.lane.b32.xlu1 %v5171_v3, %s3187_s26 }
  0x17   : > { %2899 = vmatpush3.bf16.msra.mxu0 %v3098_v2  ;;  %3048 = vmatpush3.bf16.msra.mxu1 %v3098_v2  ;;  %v308_v22 = vld [vmem:[%s3257_s12 + $0x70] sm:$0xff]   ;;  %v310_v24 = vld [vmem:[%s3257_s12 + $0x78] sm:$0xff]  }
  0x18   : > { %2900 = vmatprep.subr.bf16.mxu0 %v3099_v4  ;;  %3041 = vmatprep.subr.bf16.mxu1 %v3099_v4 }
  0x1b   : > { %2901 = vmatpush3.bf16.msra.mxu0 %v3099_v4  ;;  %3049 = vmatpush3.bf16.msra.mxu1 %v3099_v4 }
  0x1c   : > { %2902 = vmatprep.subr.bf16.mxu0 %v3100_v7  ;;  %3042 = vmatprep.subr.bf16.mxu1 %v3100_v7 }
  0x1f   : > { %2903 = vmatpush3.bf16.msra.mxu0 %v3100_v7  ;;  %3050 = vmatpush3.bf16.msra.mxu1 %v3100_v7 }
  0x20   : > { %2904 = vmatprep.subr.bf16.mxu0 %v3101_v8  ;;  %3043 = vmatprep.subr.bf16.mxu1 %v3101_v8 }
  0x23   : > { %2905 = vmatpush3.bf16.msra.mxu0 %v3101_v8  ;;  %3051 = vmatpush3.bf16.msra.mxu1 %v3101_v8 }
  0x24   : > { %2906 = vmatprep.subr.bf16.mxu0 %v3102_v9  ;;  %3044 = vmatprep.subr.bf16.mxu1 %v3102_v9 }
  0x27   : > { %2907 = vmatpush3.bf16.msra.mxu0 %v3102_v9  ;;  %3052 = vmatpush3.bf16.msra.mxu1 %v3102_v9 }
  0x28   : > { %2908 = vmatprep.subr.bf16.mxu0 %v3103_v10  ;;  %3045 = vmatprep.subr.bf16.mxu1 %v3103_v10 }
  0x2b   : > { %2909 = vmatpush3.bf16.msra.mxu0 %v3103_v10  ;;  %3053 = vmatpush3.bf16.msra.mxu1 %v3103_v10 }
  0x2e   : > { %2911 = vmatmul.mubr.bf16.vlgmr.msra.gmra.mrb[0].mxu0 %v282_v11  ;;  %2927 = vmatmul.mubr.bf16.vlgmr.msra.gmra.mrb[0].mxu1 %v298_v12 }
  0x2f   : > { %2914 = vmatprep.mubr.bf16.mxu0 %v284_v13  ;;  %2930 = vmatprep.mubr.bf16.mxu1 %v300_v14 }
  0x36   : > { %2915 = vmatmul.mubr.bf16.gmra.mrb[4].mxu0 %v286_v15  ;;  %2931 = vmatmul.mubr.bf16.gmra.mrb[4].mxu1 %v302_v16 }
  0x37   : > { %2918 = vmatprep.mubr.bf16.mxu0 %v288_v17  ;;  %2934 = vmatprep.mubr.bf16.mxu1 %v304_v18 }
  0x3e   : > { %2919 = vmatmul.mubr.bf16.gmra.mrb[8].mxu0 %v290_v19  ;;  %2935 = vmatmul.mubr.bf16.gmra.mrb[8].mxu1 %v306_v20 }
  0x3f   : > { %2922 = vmatprep.mubr.bf16.mxu0 %v292_v21  ;;  %2938 = vmatprep.mubr.bf16.mxu1 %v308_v22 }
  0x46   : > { %2923 = vmatmul.mubr.bf16.gmra.mrb[12].mxu0 %v294_v23  ;;  %2939 = vmatmul.mubr.bf16.gmra.mrb[12].mxu1 %v310_v24 }
 0x101   : > { %v2912_v27 = vpop.f32.mrb[0].mxu0  ;;  %v2928_v28 = vpop.f32.mrb[0].mxu1 }
 0x102   : > { %v522_v29 = vadd.f32 %v2912_v27, %v3297_v25  ;;  %v513_v30 = vpop.f32.mrb[1].mxu0  ;;  %v577_v31 = vpop.f32.mrb[1].mxu1  ;;  %v586_v52 = vadd.f32 %v2928_v28, %v3297_v25 }
 0x103   : > { %v514_v32 = vadd.f32 %v3297_v25, %v513_v30  ;;  %v2913_v33 = vpop.f32.mrb[2].mxu0  ;;  %v578_v34 = vadd.f32 %v3297_v25, %v577_v31  ;;  %v2929_v35 = vpop.f32.mrb[2].mxu1 }
 0x104   : > { %v642_v37 = vmax.f32 %v522_v29, 0.0  ;;  %v525_v38 = vadd.f32 %v2913_v33, %v3297_v25  ;;  %v516_v39 = vpop.f32.mrb[3].mxu0  ;;  %v580_v40 = vpop.f32.mrb[3].mxu1  ;;  %v589_v8 = vadd.f32 %v2929_v35, %v3297_v25  ;;  %v3358_v9 = vmax.f32 %v586_v52, 0.0 }
 0x105   : > { %v3305_v41 = vmax.f32 %v514_v32, 0.0  ;;  %v517_v42 = vadd.f32 %v3297_v25, %v516_v39  ;;  %v3308_v43 = vmax.f32 %v578_v34, 0.0  ;;  %v581_v44 = vadd.f32 %v3297_v25, %v580_v40 }
 0x106   : > { %v3311_v45 = vmax.f32 %v525_v38, 0.0  ;;  %1355 = vrot.lane.b32.xlu0 %v642_v37, %s3188_s29  ;;  %v707_v48 = vrot.slane %v642_v37, 7  ;;  %v998_v50 = vrot.slane %v642_v37, 1  ;;  %v3390_v18 = vmax.f32 %v589_v8, 0.0 }
 0x107   : > { %5227 = vst [vmem:[#allocation2_spill] sm:$0xff] %v3305_v41  ;;  %v3314_v46 = vmax.f32 %v517_v42, 0.0  ;;  %v3316_v47 = vmax.f32 %v581_v44, 0.0  ;;  %v5174_v55 = vrot.slane %v3305_v41, 7  ;;  %v721_v57 = vrot.slane %v3308_v43, 7 }
 0x108   : > { %1357 = vrot.lane.b32.xlu1 %v3311_v45, %s3188_s29  ;;  %v708_v49 = vrot.slane %v3311_v45, 7  ;;  %v999_v51 = vrot.slane %v3311_v45, 1  ;;  %v5173_v7 = vrot.slane %v3305_v41, 1  ;;  %v5178_v14 = vrot.slane %v3308_v43, 1 }
 0x109   : > { %v2916_v53 = vpop.f32.mrb[4].mxu0  ;;  %v3325_v54 = vpop.f32.mrb[4].mxu1  ;;  %v706_v56 = vrot.slane %v3314_v46, 7  ;;  %v5175_v62 = vrot.slane %v3316_v47, 7  ;;  %v997_v63 = vrot.slane %v3314_v46, 1  ;;  %v5176_v16 = vrot.slane %v3316_v47, 1 }
 0x10a   : > { %5228 = vst [vmem:[#allocation3_spill] sm:$0xff] %v3325_v54  ;;  %908 = vrot.lane.b32.xlu0 %v642_v37, %s3186_s13  ;;  %v529_v58 = vpop.f32.mrb[5].mxu0  ;;  %v3331_v59 = vpop.f32.mrb[5].mxu1  ;;  %v3335_v60 = vsel %vm737_vm0, %v707_v48, %v708_v49  ;;  %v3339_v61 = vsel %vm1028_vm1, %v998_v50, %v999_v51  ;;  %v538_v15 = vadd.f32 %v2916_v53, %v3297_v25 }
 0x10b   : > { %5229 = vst [vmem:[#allocation4_spill] sm:$0xff] %v3335_v60  ;;  %v530_v0 = vadd.f32 %v3297_v25, %v529_v58  ;;  %v2917_v1 = vpop.f32.mrb[6].mxu0  ;;  %v3344_v2 = vpop.f32.mrb[6].mxu1  ;;  %v3350_v4 = vsel %vm737_vm0, %v5174_v55, %v706_v56  ;;  %v3369_v11 = vsel %vm737_vm0, %v721_v57, %v5175_v62  ;;  %v3375_v12 = vsel %vm1028_vm1, %v5173_v7, %v997_v63 }
 0x10c   : > { %5230 = vst [vmem:[#allocation5_spill] sm:$0xff] %v3350_v4  ;;  %910 = vrot.lane.b32.xlu1 %v3311_v45, %s3186_s13  ;;  %v3354_v5 = vpop.f32.mrb[7].mxu1  ;;  %v532_v6 = vpop.f32.mrb[7].mxu0  ;;  %5231 = vst [vmem:[#allocation6_spill] sm:$0xff] %v3369_v11  ;;  %v3379_v13 = vsel %vm1028_vm1, %v997_v63, %v998_v50  ;;  %v3388_v17 = vsel %vm737_vm0, %v706_v56, %v707_v48  ;;  %v541_v22 = vadd.f32 %v2917_v1, %v3297_v25 }
 0x10d   : > { %v3360_v10 = vmax.f32 %v530_v0, 0.0  ;;  %v533_v19 = vadd.f32 %v3297_v25, %v532_v6  ;;  %v3406_v26 = vsel %vm1028_vm1, %v5178_v14, %v5176_v16  ;;  %v3413_v32 = vmax.f32 %v538_v15, 0.0 }
 0x10e   : > { %1799 = vrot.lane.b32.xlu0 %v642_v37, %s3189_s30  ;;  %v3421_v37 = vmax.f32 %v541_v22, 0.0 }
 0x10f   : > { %v1000_v27 = vrot.slane %v3360_v10, 1  ;;  %v709_v28 = vrot.slane %v3360_v10, 7  ;;  %v3419_v35 = vmax.f32 %v533_v19, 0.0  ;;  %v711_v44 = vrot.slane %v3413_v32, 7 }
 0x110   : > { %1801 = vrot.lane.b32.xlu1 %v3311_v45, %s3189_s30  ;;  %v712_v45 = vrot.slane %v3421_v37, 7  ;;  %v1002_v48 = vrot.slane %v3413_v32, 1  ;;  %v1003_v50 = vrot.slane %v3421_v37, 1 }
 0x111   : > { %v2920_v20 = vpop.f32.mrb[8].mxu0  ;;  %v3393_v21 = vpop.f32.mrb[8].mxu1  ;;  %v3427_v38 = vsel %vm1028_vm1, %v999_v51, %v1000_v27  ;;  %v3431_v39 = vsel %vm737_vm0, %v708_v49, %v709_v28  ;;  %v710_v56 = vrot.slane %v3419_v35, 7  ;;  %v1001_v58 = vrot.slane %v3419_v35, 1 }
 0x112   : > { %5232 = vst [vmem:[#allocation7_spill] sm:$0xff] %v3393_v21  ;;  %1387 = vrot.lane.b32.xlu0 %v3358_v9, %s3188_s29  ;;  %v545_v23 = vpop.f32.mrb[9].mxu0  ;;  %v3398_v24 = vpop.f32.mrb[9].mxu1  ;;  %v554_v40 = vadd.f32 %v2920_v20, %v3297_v25  ;;  %v3456_v1 = vsel %vm737_vm0, %v711_v44, %v712_v45  ;;  %v3460_v6 = vsel %vm1028_vm1, %v1002_v48, %v1003_v50 }
 0x113   : > { %v546_v29 = vadd.f32 %v3297_v25, %v545_v23  ;;  %v2921_v30 = vpop.f32.mrb[10].mxu0  ;;  %v3411_v31 = vpop.f32.mrb[10].mxu1  ;;  %5233 = vst [vmem:[#allocation8_spill] sm:$0xff] %v3456_v1  ;;  %v3468_v20 = vsel %vm737_vm0, %v709_v28, %v710_v56  ;;  %v3472_v22 = vsel %vm1028_vm1, %v1000_v27, %v1001_v58  ;;  %v3485_v28 = vsel %vm1028_vm1, %v1001_v58, %v1002_v48 }
 0x114   : > { %1389 = vrot.lane.b32.xlu1 %v3390_v18, %s3188_s29  ;;  %v548_v33 = vpop.f32.mrb[11].mxu0  ;;  %v3417_v34 = vpop.f32.mrb[11].mxu1  ;;  %v557_v51 = vadd.f32 %v2921_v30, %v3297_v25  ;;  %v3462_v8 = vmax.f32 %v554_v40, 0.0  ;;  %5234 = vst [vmem:[#allocation9_spill] sm:$0xff] %v3468_v20  ;;  %v3489_v27 = vsel %vm737_vm0, %v710_v56, %v711_v44 }
 0x115   : > { %v3434_v42 = vmax.f32 %v546_v29, 0.0  ;;  %v549_v49 = vadd.f32 %v3297_v25, %v548_v33 }
 0x116   : > { %904 = vrot.lane.b32.xlu0 %v3305_v41, %s3186_s13  ;;  %v3479_v33 = vmax.f32 %v557_v51, 0.0  ;;  %v715_v48 = vrot.slane %v3462_v8, 7  ;;  %v1006_v56 = vrot.slane %v3462_v8, 1 }
 0x117   : > { %v1004_v23 = vrot.slane %v3434_v42, 1  ;;  %v3481_v40 = vmax.f32 %v549_v49, 0.0  ;;  %v713_v49 = vrot.slane %v3434_v42, 7 }
 0x118   : > { %1353 = vrot.lane.b32.xlu1 %v3314_v46, %s3188_s29  ;;  %v716_v58 = vrot.slane %v3479_v33, 7 }
 0x119   : > { %v3444_v52 = vpop.f32.mrb[12].mxu0  ;;  %v3446_v53 = vpop.f32.mrb[12].mxu1  ;;  %v3499_v51 = vsel %vm1028_vm1, %v1003_v50, %v1004_v23  ;;  %v1005_v55 = vrot.slane %v3481_v40, 1 }
 0x11a   : > { %v561_v63 = vpop.f32.mrb[13].mxu0  ;;  %v3450_v0 = vpop.f32.mrb[13].mxu1  ;;  %1351 = vrot.lane.b32.xlu0 %v3305_v41, %s3188_s29  ;;  %v3516_v50 = vsel %vm737_vm0, %v715_v48, %v716_v58 }
 0x11b   : > { %v2925_v15 = vpop.f32.mrb[14].mxu0  ;;  %v3464_v19 = vpop.f32.mrb[14].mxu1  ;;  %v562_v29 = vadd.f32 %v3297_v25, %v561_v63  ;;  %v594_v63 = vadd.f32 %v3297_v25, %v3331_v59  ;;  %5235 = vst [vmem:[#allocation10_spill] sm:$0xff] %v3516_v50  ;;  %v3545_v16 = vsel %vm1028_vm1, %v1004_v23, %v1005_v55 }
 0x11c   : > { %v573_v30 = vadd.f32 %v2925_v15, %v3297_v25  ;;  %938 = vrot.lane.b32.xlu1 %v3316_v47, %s3186_s13  ;;  %v3512_v15 = vsel %vm737_vm0, %v712_v45, %v713_v49 }
 0x11d   : > { %v3504_v44 = vmax.f32 %v562_v29, 0.0  ;;  %v714_v29 = vrot.slane %v3481_v40, 7  ;;  %v3520_v7 = vmax.f32 %v594_v63, 0.0 }
 0x11e   : > { %v3493_v3 = vmax.f32 %v573_v30, 0.0  ;;  %936 = vrot.lane.b32.xlu0 %v3308_v43, %s3186_s13  ;;  %v1007_v30 = vrot.slane %v3479_v33, 1 }
 0x11f   : > { %v3539_v63 = vsel %vm737_vm0, %v713_v49, %v714_v29  ;;  %v5181_v14 = vrot.slane %v3504_v44, 1  ;;  %v724_v49 = vrot.slane %v3390_v18, 7  ;;  %v717_v21 = vrot.slane %v3504_v44, 7 }
 0x120   : > { %1829 = vrot.lane.b32.xlu1 %v3316_v47, %s3189_s30  ;;  %v5177_v59 = vrot.slane %v3493_v3, 7  ;;  %v3535_v62 = vsel %vm1028_vm1, %v1006_v56, %v1007_v30  ;;  %5236 = vst [vmem:[#allocation11_spill] sm:$0xff] %v3539_v63  ;;  %v1011_v54 = vrot.slane %v3493_v3, 1  ;;  %v5180_v23 = vrot.slane %v3520_v7, 7 }
 0x122   : > { %1827 = vrot.lane.b32.xlu0 %v3308_v43, %s3189_s30  ;;  %v3530_v45 = vsel %vm737_vm0, %v5177_v59, %v721_v57  ;;  %v3549_v57 = vsel %vm1028_vm1, %v1005_v55, %v1006_v56  ;;  %v3553_v59 = vsel %vm737_vm0, %v714_v29, %v715_v48  ;;  %v3565_v55 = vsel %vm1028_vm1, %v1007_v30, %v5181_v14 }
 0x123   : > { %v3572_v48 = vsel %vm737_vm0, %v716_v58, %v717_v21  ;;  %v5237_v56 = vrot.slane %v3308_v43, 1  ;;  %v3586_v30 = vsel %vm737_vm0, %v724_v49, %v5180_v23  ;;  %v723_v58 = vrot.slane %v3358_v9, 7 }
 0x124   : > { %1385 = vrot.lane.b32.xlu1 %v3316_v47, %s3188_s29  ;;  %v570_v23 = vadd.f32 %v3444_v52, %v3297_v25 }
 0x125   : > { %v3578_v29 = vsel %vm1028_vm1, %v1011_v54, %v5237_v56  ;;  %v5239_v56 = vrot.slane %v3316_v47, 1 }
 0x126   : > { %1383 = vrot.lane.b32.xlu0 %v3308_v43, %s3188_s29  ;;  %v3597_v43 = vsel %vm737_vm0, %v723_v58, %v724_v49  ;;  %v5179_v49 = vrot.slane %v3358_v9, 1 }
 0x127   : > { %5238 = vst [vmem:[#allocation12_spill] sm:$0xff] %v3597_v43 }
 0x128   : > { %1261 = vrot.lane.b32.xlu1 %v3335_v60, %s3190_s8 }
 0x12a   : > { %906 = vrot.lane.b32.xlu0 %v3314_v46, %s3186_s13  ;;  %v3610_v46 = vadd.s32 8, %v3302_v36 }
 0x12c   : > { %1673 = vrot.lane.b32.xlu1 %v3335_v60, %s3191_s9  ;;  %vm1062_vm2 = vcmp.le.s32.totalorder %v3610_v46, 14 }
 0x12e   : > { %1483 = vrot.lane.b32.xlu0 %v3339_v61, %s3192_s10 }
 0x130   : > { %1293 = vrot.lane.b32.xlu1 %v3597_v43, %s3190_s8 }
 0x132   : > { %1135 = vrot.lane.b32.xlu0 %v3339_v61, %s3187_s26 }
 0x134   : > { %1257 = vrot.lane.b32.xlu1 %v3350_v4, %s3190_s8 }
 0x136   : > { %1959 = vrot.lane.b32.xlu0 %v3339_v61, %s3193_s11  ;;  %v1098_v61 = vsel %vm1062_vm2, %v3379_v13, 0.0 }
 0x138   : > { %1701 = vrot.lane.b32.xlu1 %v3369_v11, %s3191_s9 }
 0x13a   : > { %1131 = vrot.lane.b32.xlu0 %v3375_v12, %s3187_s26 }
 0x13c   : > { %1289 = vrot.lane.b32.xlu1 %v3369_v11, %s3190_s8 }
 0x13e   : > { %1479 = vrot.lane.b32.xlu0 %v3375_v12, %s3192_s10  ;;  %v1042_v12 = vsel %vm1028_vm1, %v5239_v56, %v5179_v49  ;;  %v5241_v56 = vrot.slane %v3316_v47, 7  ;;  %v564_v49 = vpop.f32.mrb[15].mxu0  ;;  %v3672_v47 = vmax.f32 %v570_v23, 0.0 }
 0x13f   : > { %v3638_v13 = vsel %vm1062_vm2, %v1042_v12, 0.0  ;;  %v565_v14 = vadd.f32 %v3297_v25, %v564_v49 }
 0x140   : > { %1133 = vrot.lane.b32.xlu1 %v1098_v61, %s3187_s26  ;;  %v751_v12 = vsel %vm737_vm0, %v5241_v56, %v723_v58  ;;  %v719_v52 = vrot.slane %v3672_v47, 7  ;;  %v1010_v49 = vrot.slane %v3672_v47, 1 }
 0x141   : > { %v3674_v58 = vmax.f32 %v565_v14, 0.0  ;;  %v5243_v14 = vrot.slane %v3493_v3, 7 }
 0x142   : > { %1163 = vrot.lane.b32.xlu0 %v3406_v26, %s3187_s26 }
 0x143   : > { %v718_v56 = vrot.slane %v3674_v58, 7  ;;  %v3690_v23 = vsel %vm737_vm0, %v719_v52, %v5243_v14 }
 0x144   : > { %1481 = vrot.lane.b32.xlu1 %v1098_v61, %s3192_s10  ;;  %v3645_v61 = vsel %vm802_vm3, %v3388_v17, 0.0  ;;  %v3661_v17 = vsel %vm802_vm3, %v751_v12, 0.0  ;;  %v1009_v12 = vrot.slane %v3674_v58, 1  ;;  %5244 = vst [vmem:[#allocation15_spill] sm:$0xff] %v3690_v23 }
 0x145   : > { %5240 = vst [vmem:[#allocation13_spill] sm:$0xff] %v3645_v61  ;;  %5242 = vst [vmem:[#allocation14_spill] sm:$0xff] %v3661_v17  ;;  %v3700_v11 = vsel %vm737_vm0, %v717_v21, %v718_v56  ;;  %v1100_v21 = vsel %vm1062_vm2, %v3427_v38, 0.0  ;;  %v597_v38 = vadd.f32 %v3297_v25, %v3354_v5 }
 0x146   : > { %1987 = vrot.lane.b32.xlu0 %v3406_v26, %s3193_s11  ;;  %5245 = vst [vmem:[#allocation16_spill] sm:$0xff] %v3700_v11  ;;  %v3712_v14 = vsel %vm1028_vm1, %v1009_v12, %v1010_v49 }
 0x148   : > { %1165 = vrot.lane.b32.xlu1 %v3638_v13, %s3187_s26 }
 0x14a   : > { %1259 = vrot.lane.b32.xlu0 %v3645_v61, %s3190_s8 }
 0x14c   : > { %1989 = vrot.lane.b32.xlu1 %v3638_v13, %s3193_s11 }
 0x14e   : > { %1671 = vrot.lane.b32.xlu0 %v3645_v61, %s3191_s9  ;;  %v5246_v61 = vrot.slane %v3504_v44, 1 }
 0x150   : > { %1365 = vrot.lane.b32.xlu1 %v3421_v37, %s3188_s29  ;;  %v3706_v60 = vsel %vm1028_vm1, %v5246_v61, %v1009_v12  ;;  %v605_v61 = vadd.f32 %v3344_v2, %v3297_v25  ;;  %v3765_v12 = vmax.f32 %v597_v38, 0.0  ;;  %v5255_v38 = vrot.slane %v3520_v7, 7 }
 0x152   : > { %1291 = vrot.lane.b32.xlu0 %v3661_v17, %s3190_s8 }
 0x154   : > { %918 = vrot.lane.b32.xlu1 %v3421_v37, %s3186_s13 }
 0x156   : > { %1363 = vrot.lane.b32.xlu0 %v3413_v32, %s3188_s29 }
 0x158   : > { %1809 = vrot.lane.b32.xlu1 %v3421_v37, %s3189_s30  ;;  %v3694_v37 = vsel %vm1028_vm1, %v1010_v49, %v1011_v54  ;;  %v3716_v54 = vsel %vm737_vm0, %v718_v56, %v719_v52  ;;  %v610_v52 = vadd.f32 %v3297_v25, %v3398_v24  ;;  %v628_v49 = vpop.f32.mrb[15].mxu1  ;;  %v621_v24 = vadd.f32 %v3411_v31, %v3297_v25 }
 0x15a   : > { %916 = vrot.lane.b32.xlu0 %v3413_v32, %s3186_s13 }
 0x15c   : > { %914 = vrot.lane.b32.xlu1 %v3419_v35, %s3186_s13 }
 0x15e   : > { %1807 = vrot.lane.b32.xlu0 %v3413_v32, %s3189_s30  ;;  %v3736_v32 = vsel %vm802_vm3, %v3431_v39, 0.0 }
 0x15f   : > { %5247 = vst [vmem:[#allocation17_spill] sm:$0xff] %v3736_v32 }
 0x160   : > { %1805 = vrot.lane.b32.xlu1 %v3419_v35, %s3189_s30 }
 0x162   : > { %912 = vrot.lane.b32.xlu0 %v3360_v10, %s3186_s13 }
 0x164   : > { %1361 = vrot.lane.b32.xlu1 %v3419_v35, %s3188_s29  ;;  %v3740_v35 = vpop.permute.xlu1 %3072 }
 0x166   : > { %1803 = vrot.lane.b32.xlu0 %v3360_v10, %s3189_s30 }
 0x168   : > { %1485 = vrot.lane.b32.xlu1 %v1100_v21, %s3192_s10 }
 0x16a   : > { %1359 = vrot.lane.b32.xlu0 %v3360_v10, %s3188_s29  ;;  %v3747_v10 = vpop.permute.xlu1 %3077 }
 0x16c   : > { %1137 = vrot.lane.b32.xlu1 %v1100_v21, %s3187_s26 }
 0x16e   : > { %1675 = vrot.lane.b32.xlu0 %v3736_v32, %s3191_s9 }
 0x170   : > { %1269 = vrot.lane.b32.xlu1 %v3456_v1, %s3190_s8 }
 0x172   : > { %1263 = vrot.lane.b32.xlu0 %v3736_v32, %s3190_s8  ;;  %v613_v32 = vadd.f32 %v3297_v25, %v3417_v34 }
 0x174   : > { %1961 = vrot.lane.b32.xlu1 %v1100_v21, %s3193_s11  ;;  %v3771_v21 = vmax.f32 %v605_v61, 0.0  ;;  %v5189_v61 = vrot.slane %v3765_v12, 1 }
 0x176   : > { %1491 = vrot.lane.b32.xlu0 %v3460_v6, %s3192_s10 }
 0x178   : > { %v3753_v39 = vpop.permute.xlu0 %1355  ;;  %1681 = vrot.lane.b32.xlu1 %v3456_v1, %s3191_s9  ;;  %v3773_v1 = vmax.f32 %v610_v52, 0.0  ;;  %v5188_v52 = vrot.slane %v3765_v12, 7 }
 0x179   : > { %5248 = vst [vmem:[#allocation18_spill] sm:$0xff] %v3753_v39  ;;  %v5257_v39 = vrot.slane %v3520_v7, 1 }
 0x17a   : > { %v3761_v56 = vpop.permute.xlu1 %1357  ;;  %1143 = vrot.lane.b32.xlu0 %v3460_v6, %s3187_s26  ;;  %5251 = vst [vmem:[#allocation21_spill] sm:$0xff] %v3773_v1  ;;  %v1020_v31 = vrot.slane %v3773_v1, 1  ;;  %v3805_v34 = vsel %vm737_vm0, %v5255_v38, %v5188_v52 }
 0x17b   : > { %5249 = vst [vmem:[#allocation19_spill] sm:$0xff] %v3761_v56  ;;  %5256 = vst [vmem:[#allocation25_spill] sm:$0xff] %v3805_v34 }
 0x17c   : > { %v3767_v5 = vpop.permute.xlu0 %908  ;;  %1677 = vrot.lane.b32.xlu1 %v3468_v20, %s3191_s9 }
 0x17d   : > { %5250 = vst [vmem:[#allocation20_spill] sm:$0xff] %v3767_v5 }
 0x17e   : > { %v3775_v2 = vpop.permute.xlu1 %910  ;;  %1967 = vrot.lane.b32.xlu0 %v3460_v6, %s3193_s11  ;;  %v729_v6 = vrot.slane %v3773_v1, 7  ;;  %v3836_v1 = vmax.f32 %v621_v24, 0.0 }
 0x17f   : > { %5252 = vst [vmem:[#allocation22_spill] sm:$0xff] %v3775_v2  ;;  %v5261_v2 = vrot.slane %v3771_v21, 7 }
 0x180   : > { %v3781_v56 = vpop.permute.xlu0 %1799  ;;  %1265 = vrot.lane.b32.xlu1 %v3468_v20, %s3190_s8  ;;  %v5258_v20 = vrot.slane %v3771_v21, 1  ;;  %5263 = vst [vmem:[#allocation29_spill] sm:$0xff] %v3836_v1 }
 0x181   : > { %5253 = vst [vmem:[#allocation23_spill] sm:$0xff] %v3781_v56  ;;  %v626_v56 = vadd.f32 %v3297_v25, %v3450_v0  ;;  %v3813_v0 = vsel %vm1028_vm1, %v5257_v39, %v5189_v61  ;;  %v3832_v39 = vsel %vm737_vm0, %v5261_v2, %v729_v6  ;;  %v3834_v61 = vmax.f32 %v613_v32, 0.0 }
 0x182   : > { %v3795_v5 = vpop.permute.xlu1 %1801  ;;  %1139 = vrot.lane.b32.xlu0 %v3472_v22, %s3187_s26  ;;  %v3823_v38 = vsel %vm1028_vm1, %v5258_v20, %v1020_v31  ;;  %5262 = vst [vmem:[#allocation28_spill] sm:$0xff] %v3832_v39  ;;  %v629_v2 = vadd.f32 %v3297_v25, %v628_v49  ;;  %v5197_v39 = vrot.slane %v3836_v1, 1 }
 0x183   : > { %5254 = vst [vmem:[#allocation24_spill] sm:$0xff] %v3795_v5  ;;  %v1102_v5 = vsel %vm1062_vm2, %v3485_v28, 0.0  ;;  %5259 = vst [vmem:[#allocation26_spill] sm:$0xff] %v3823_v38  ;;  %v3838_v28 = vmax.f32 %v626_v56, 0.0  ;;  %v5194_v32 = vrot.slane %v3834_v61, 1  ;;  %v5193_v24 = vrot.slane %v3834_v61, 7 }
 0x184   : > { %v3825_v52 = vpop.permute.xlu0 %1387  ;;  %1141 = vrot.lane.b32.xlu1 %v1102_v5, %s3187_s26 }
 0x185   : > { %5260 = vst [vmem:[#allocation27_spill] sm:$0xff] %v3825_v52  ;;  %5264 = vst [vmem:[#allocation30_spill] sm:$0xff] %v3838_v28  ;;  %v634_v52 = vadd.f32 %v3446_v53, %v3297_v25  ;;  %v1024_v38 = vrot.slane %v3838_v28, 1  ;;  %v3863_v53 = vsel %vm737_vm0, %v729_v6, %v5193_v24  ;;  %v3869_v49 = vsel %vm1028_vm1, %v1020_v31, %v5194_v32 }
 0x186   : > { %v3840_v4 = vpop.permute.xlu1 %1389  ;;  %1963 = vrot.lane.b32.xlu0 %v3472_v22, %s3193_s11  ;;  %5267 = vst [vmem:[#allocation33_spill] sm:$0xff] %v3863_v53  ;;  %5268 = vst [vmem:[#allocation34_spill] sm:$0xff] %v3869_v49  ;;  %v3886_v24 = vsel %vm802_vm3, %v3489_v27, 0.0  ;;  %v3888_v31 = vmax.f32 %v629_v2, 0.0  ;;  %v5272_v32 = vrot.slane %v3836_v1, 7  ;;  %v1108_v49 = vsel %vm1062_vm2, %v3565_v55, 0.0 }
 0x187   : > { %5265 = vst [vmem:[#allocation31_spill] sm:$0xff] %v3840_v4  ;;  %v3879_v4 = vsel %vm1028_vm1, %v5197_v39, %v1024_v38  ;;  %v3881_v6 = vmax.f32 %v634_v52, 0.0  ;;  %v4135_v55 = vsel %vm802_vm3, %v3572_v48, 0.0  ;;  %v637_v48 = vadd.f32 %v3464_v19, %v3297_v25  ;;  %v3127_v53 = vld [vmem:[%s5165_s2 + $0x38] sm:$0xff]  }
 0x188   : > { %v3844_v20 = vpop.permute.xlu0 %904  ;;  %1965 = vrot.lane.b32.xlu1 %v1102_v5, %s3193_s11  ;;  %5269 = vst [vmem:[#allocation35_spill] sm:$0xff] %v3879_v4  ;;  %5271 = vst [vmem:[#allocation37_spill] sm:$0xff] %v3888_v31  ;;  %v1025_v27 = vrot.slane %v3888_v31, 1  ;;  %v734_v39 = vrot.slane %v3888_v31, 7 }
 0x189   : > { %5270 = vst [vmem:[#allocation36_spill] sm:$0xff] %v3881_v6  ;;  %v5200_v2 = vrot.slane %v3881_v6, 1  ;;  %5307 = vst [vmem:[#allocation72_spill] sm:$0xff] %v4135_v55 }
 0x18a   : > { %v3852_v56 = vpop.permute.xlu1 %1353  ;;  %1487 = vrot.lane.b32.xlu0 %v3472_v22, %s3192_s10  ;;  %v733_v22 = vrot.slane %v3838_v28, 7 }
 0x18b   : > { %5266 = vst [vmem:[#allocation32_spill] sm:$0xff] %v3852_v56 }
 0x18c   : > { %v3872_v56 = vpop.permute.xlu0 %1351  ;;  %1489 = vrot.lane.b32.xlu1 %v1102_v5, %s3192_s10  ;;  %v3894_v5 = vsel %vm737_vm0, %v5272_v32, %v733_v22  ;;  %v5201_v32 = vrot.slane %v3881_v6, 7 }
 0x18d   : > { %5273 = vst [vmem:[#allocation38_spill] sm:$0xff] %v3894_v5  ;;  %v3924_v5 = vsel %vm1028_vm1, %v1024_v38, %v1025_v27 }
 0x18e   : > { %v3896_v28 = vpop.permute.xlu1 %938  ;;  %1267 = vrot.lane.b32.xlu0 %v3886_v24, %s3190_s8  ;;  %5279 = vst [vmem:[#allocation44_spill] sm:$0xff] %v3924_v5 }
 0x18f   : > { %5274 = vst [vmem:[#allocation39_spill] sm:$0xff] %v3896_v28  ;;  %v3920_v28 = vsel %vm737_vm0, %v733_v22, %v734_v39 }
 0x190   : > { %v3900_v52 = vpop.permute.xlu0 %936  ;;  %1373 = vrot.lane.b32.xlu1 %v3479_v33, %s3188_s29  ;;  %5278 = vst [vmem:[#allocation43_spill] sm:$0xff] %v3920_v28 }
 0x191   : > { %5275 = vst [vmem:[#allocation40_spill] sm:$0xff] %v3900_v52  ;;  %v3916_v52 = vsel %vm1028_vm1, %v1025_v27, %v5200_v2 }
 0x192   : > { %v3907_v4 = vpop.permute.xlu1 %1829  ;;  %1679 = vrot.lane.b32.xlu0 %v3886_v24, %s3191_s9  ;;  %5277 = vst [vmem:[#allocation42_spill] sm:$0xff] %v3916_v52 }
 0x193   : > { %5276 = vst [vmem:[#allocation41_spill] sm:$0xff] %v3907_v4  ;;  %v3934_v4 = vsel %vm737_vm0, %v734_v39, %v5201_v32 }
 0x194   : > { %v3926_v31 = vpop.permute.xlu0 %1827  ;;  %926 = vrot.lane.b32.xlu1 %v3479_v33, %s3186_s13  ;;  %5281 = vst [vmem:[#allocation46_spill] sm:$0xff] %v3934_v4 }
 0x195   : > { %5280 = vst [vmem:[#allocation45_spill] sm:$0xff] %v3926_v31 }
 0x196   : > { %v3936_v2 = vpop.permute.xlu1 %1385  ;;  %1371 = vrot.lane.b32.xlu0 %v3462_v8, %s3188_s29 }
 0x197   : > { %5282 = vst [vmem:[#allocation47_spill] sm:$0xff] %v3936_v2 }
 0x198   : > { %v3940_v22 = vpop.permute.xlu0 %1383  ;;  %1817 = vrot.lane.b32.xlu1 %v3479_v33, %s3189_s30 }
 0x199   : > { %5283 = vst [vmem:[#allocation48_spill] sm:$0xff] %v3940_v22 }
 0x19a   : > { %v3944_v38 = vpop.permute.xlu1 %1261  ;;  %924 = vrot.lane.b32.xlu0 %v3462_v8, %s3186_s13 }
 0x19c   : > { %v3948_v27 = vpop.permute.xlu0 %906  ;;  %922 = vrot.lane.b32.xlu1 %v3481_v40, %s3186_s13 }
 0x19e   : > { %v3952_v39 = vpop.permute.xlu1 %1673  ;;  %1815 = vrot.lane.b32.xlu0 %v3462_v8, %s3189_s30  ;;  %v1104_v8 = vsel %vm1062_vm2, %v3499_v51, 0.0 }
 0x1a0   : > { %v3956_v32 = vpop.permute.xlu0 %1483  ;;  %1813 = vrot.lane.b32.xlu1 %v3481_v40, %s3189_s30 }
 0x1a2   : > { %v3960_v33 = vpop.permute.xlu1 %1293  ;;  %920 = vrot.lane.b32.xlu0 %v3434_v42, %s3186_s13 }
 0x1a3   : > { %5284 = vst [vmem:[#allocation49_spill] sm:$0xff] %v3960_v33 }
 0x1a4   : > { %v3964_v4 = vpop.permute.xlu0 %1135  ;;  %1369 = vrot.lane.b32.xlu1 %v3481_v40, %s3188_s29  ;;  %v3988_v40 = vsel %vm802_vm3, %v3512_v15, 0.0 }
 0x1a5   : > { %5287 = vst [vmem:[#allocation52_spill] sm:$0xff] %v3988_v40 }
 0x1a6   : > { %1811 = vrot.lane.b32.xlu0 %v3434_v42, %s3189_s30  ;;  %v3970_v6 = vpop.permute.xlu1 %1257 }
 0x1a8   : > { %v3975_v22 = vpop.permute.xlu0 %1959  ;;  %1493 = vrot.lane.b32.xlu1 %v1104_v8, %s3192_s10 }
 0x1a9   : > { %5285 = vst [vmem:[#allocation50_spill] sm:$0xff] %v3975_v22 }
 0x1aa   : > { %1367 = vrot.lane.b32.xlu0 %v3434_v42, %s3188_s29  ;;  %v3980_v33 = vpop.permute.xlu1 %1701 }
 0x1ab   : > { %5286 = vst [vmem:[#allocation51_spill] sm:$0xff] %v3980_v33 }
 0x1ac   : > { %v3982_v2 = vpop.permute.xlu0 %1131  ;;  %1145 = vrot.lane.b32.xlu1 %v1104_v8, %s3187_s26 }
 0x1ae   : > { %1683 = vrot.lane.b32.xlu0 %v3988_v40, %s3191_s9  ;;  %v3992_v51 = vpop.permute.xlu1 %1289 }
 0x1af   : > { %5288 = vst [vmem:[#allocation53_spill] sm:$0xff] %v3992_v51 }
 0x1b0   : > { %v3994_v5 = vpop.permute.xlu0 %1479  ;;  %1277 = vrot.lane.b32.xlu1 %v3516_v50, %s3190_s8 }
 0x1b1   : > { %5289 = vst [vmem:[#allocation54_spill] sm:$0xff] %v3994_v5 }
 0x1b2   : > { %1271 = vrot.lane.b32.xlu0 %v3988_v40, %s3190_s8  ;;  %v4000_v42 = vpop.permute.xlu1 %1133 }
 0x1b4   : > { %v4002_v28 = vpop.permute.xlu0 %1163  ;;  %1969 = vrot.lane.b32.xlu1 %v1104_v8, %s3193_s11 }
 0x1b5   : > { %5290 = vst [vmem:[#allocation55_spill] sm:$0xff] %v4002_v28 }
 0x1b6   : > { %1499 = vrot.lane.b32.xlu0 %v3535_v62, %s3192_s10  ;;  %v4007_v15 = vpop.permute.xlu1 %1481 }
 0x1b8   : > { %v4009_v51 = vpop.permute.xlu0 %1987  ;;  %1689 = vrot.lane.b32.xlu1 %v3516_v50, %s3191_s9 }
 0x1b9   : > { %5291 = vst [vmem:[#allocation56_spill] sm:$0xff] %v4009_v51 }
 0x1ba   : > { %1151 = vrot.lane.b32.xlu0 %v3535_v62, %s3187_s26  ;;  %v4015_v52 = vpop.permute.xlu1 %1165 }
 0x1bb   : > { %5292 = vst [vmem:[#allocation57_spill] sm:$0xff] %v4015_v52  ;;  %v1106_v52 = vsel %vm1062_vm2, %v3549_v57, 0.0  ;;  %v4056_v57 = vsel %vm802_vm3, %v3553_v59, 0.0 }
 0x1bc   : > { %v4017_v31 = vpop.permute.xlu0 %1259  ;;  %1685 = vrot.lane.b32.xlu1 %v3539_v63, %s3191_s9  ;;  %5299 = vst [vmem:[#allocation64_spill] sm:$0xff] %v4056_v57 }
 0x1be   : > { %1975 = vrot.lane.b32.xlu0 %v3535_v62, %s3193_s11  ;;  %v4023_v8 = vpop.permute.xlu1 %1989 }
 0x1bf   : > { %5293 = vst [vmem:[#allocation58_spill] sm:$0xff] %v4023_v8 }
 0x1c0   : > { %v4025_v28 = vpop.permute.xlu0 %1671  ;;  %1273 = vrot.lane.b32.xlu1 %v3539_v63, %s3190_s8 }
 0x1c1   : > { %5294 = vst [vmem:[#allocation59_spill] sm:$0xff] %v4025_v28  ;;  %v3120_v28 = vld [vmem:[%s5165_s2] sm:$0xff]  }
 0x1c2   : > { %1147 = vrot.lane.b32.xlu0 %v3545_v16, %s3187_s26  ;;  %v4031_v51 = vpop.permute.xlu1 %1365  ;;  %2942 = vmatprep.subr.bf16.mxu1 %v3120_v28 }
 0x1c3   : > { %5295 = vst [vmem:[#allocation60_spill] sm:$0xff] %v4031_v51  ;;  %2943 = vmatpush3.bf16.msra.mxu1 %v3120_v28  ;;  %v3122_v28 = vld [vmem:[%s5165_s2 + $0x10] sm:$0xff]  }
 0x1c4   : > { %v4036_v33 = vpop.permute.xlu0 %1291  ;;  %1149 = vrot.lane.b32.xlu1 %v1106_v52, %s3187_s26 }
 0x1c5   : > { %5296 = vst [vmem:[#allocation61_spill] sm:$0xff] %v4036_v33 }
 0x1c6   : > { %1971 = vrot.lane.b32.xlu0 %v3545_v16, %s3193_s11  ;;  %v4041_v62 = vpop.permute.xlu1 %918 }
 0x1c8   : > { %v4043_v8 = vpop.permute.xlu0 %1363  ;;  %1973 = vrot.lane.b32.xlu1 %v1106_v52, %s3193_s11 }
 0x1c9   : > { %5297 = vst [vmem:[#allocation62_spill] sm:$0xff] %v4043_v8  ;;  %v3121_v8 = vld [vmem:[%s5165_s2 + $0x8] sm:$0xff]  }
 0x1ca   : > { %1495 = vrot.lane.b32.xlu0 %v3545_v16, %s3192_s10  ;;  %v4048_v1 = vpop.permute.xlu1 %1809  ;;  %2944 = vmatprep.subr.bf16.mxu1 %v3121_v8 }
 0x1cb   : > { %5298 = vst [vmem:[#allocation63_spill] sm:$0xff] %v4048_v1  ;;  %2945 = vmatpush3.bf16.msra.mxu1 %v3121_v8 }
 0x1cc   : > { %v4050_v22 = vpop.permute.xlu0 %916  ;;  %1497 = vrot.lane.b32.xlu1 %v1106_v52, %s3192_s10  ;;  %2946 = vmatprep.subr.bf16.mxu1 %v3122_v28 }
 0x1ce   : > { %1275 = vrot.lane.b32.xlu0 %v4056_v57, %s3190_s8  ;;  %v4060_v33 = vpop.permute.xlu1 %914 }
 0x1cf   : > { %2947 = vmatpush3.bf16.msra.mxu1 %v3122_v28  ;;  %v4160_v28 = vmax.f32 %v637_v48, 0.0 }
 0x1d0   : > { %v4062_v50 = vpop.permute.xlu0 %1807  ;;  %1381 = vrot.lane.b32.xlu1 %v3493_v3, %s3188_s29 }
 0x1d1   : > { %5300 = vst [vmem:[#allocation65_spill] sm:$0xff] %v4062_v50  ;;  %5309 = vst [vmem:[#allocation74_spill] sm:$0xff] %v4160_v28 }
 0x1d2   : > { %1687 = vrot.lane.b32.xlu0 %v4056_v57, %s3191_s9  ;;  %v4068_v16 = vpop.permute.xlu1 %1805 }
 0x1d3   : > { %5301 = vst [vmem:[#allocation66_spill] sm:$0xff] %v4068_v16 }
 0x1d4   : > { %v4070_v52 = vpop.permute.xlu0 %912  ;;  %934 = vrot.lane.b32.xlu1 %v3493_v3, %s3186_s13 }
 0x1d6   : > { %1379 = vrot.lane.b32.xlu0 %v3672_v47, %s3188_s29  ;;  %v4076_v59 = vpop.permute.xlu1 %1361 }
 0x1d8   : > { %v4078_v1 = vpop.permute.xlu0 %1803  ;;  %1825 = vrot.lane.b32.xlu1 %v3493_v3, %s3189_s30 }
 0x1d9   : > { %5302 = vst [vmem:[#allocation67_spill] sm:$0xff] %v4078_v1 }
 0x1da   : > { %932 = vrot.lane.b32.xlu0 %v3672_v47, %s3186_s13  ;;  %v4084_v57 = vpop.permute.xlu1 %1485 }
 0x1dc   : > { %v4086_v51 = vpop.permute.xlu0 %1359  ;;  %930 = vrot.lane.b32.xlu1 %v3674_v58, %s3186_s13 }
 0x1de   : > { %1823 = vrot.lane.b32.xlu0 %v3672_v47, %s3189_s30  ;;  %v4092_v40 = vpop.permute.xlu1 %1137 }
 0x1e0   : > { %v4094_v50 = vpop.permute.xlu0 %1675  ;;  %1821 = vrot.lane.b32.xlu1 %v3674_v58, %s3189_s30 }
 0x1e2   : > { %928 = vrot.lane.b32.xlu0 %v3504_v44, %s3186_s13  ;;  %v4100_v3 = vpop.permute.xlu1 %1269 }
 0x1e3   : > { %5303 = vst [vmem:[#allocation68_spill] sm:$0xff] %v4100_v3 }
 0x1e4   : > { %v4105_v16 = vpop.permute.xlu0 %1263  ;;  %1377 = vrot.lane.b32.xlu1 %v3674_v58, %s3188_s29 }
 0x1e6   : > { %1819 = vrot.lane.b32.xlu0 %v3504_v44, %s3189_s30  ;;  %v4111_v47 = vpop.permute.xlu1 %1961 }
 0x1e7   : > { %5304 = vst [vmem:[#allocation69_spill] sm:$0xff] %v4111_v47 }
 0x1e8   : > { %v4116_v63 = vpop.permute.xlu0 %1491  ;;  %1501 = vrot.lane.b32.xlu1 %v1108_v49, %s3192_s10 }
 0x1e9   : > { %5305 = vst [vmem:[#allocation70_spill] sm:$0xff] %v4116_v63  ;;  %v3123_v63 = vld [vmem:[%s5165_s2 + $0x18] sm:$0xff]  }
 0x1ea   : > { %1375 = vrot.lane.b32.xlu0 %v3504_v44, %s3188_s29  ;;  %v4124_v58 = vpop.permute.xlu1 %1681  ;;  %2948 = vmatprep.subr.bf16.mxu1 %v3123_v63 }
 0x1eb   : > { %5306 = vst [vmem:[#allocation71_spill] sm:$0xff] %v4124_v58  ;;  %v3124_v58 = vld [vmem:[%s5165_s2 + $0x20] sm:$0xff]   ;;  %2949 = vmatpush3.bf16.msra.mxu1 %v3123_v63 }
 0x1ec   : > { %v4129_v47 = vpop.permute.xlu0 %1143  ;;  %1153 = vrot.lane.b32.xlu1 %v1108_v49, %s3187_s26  ;;  %2950 = vmatprep.subr.bf16.mxu1 %v3124_v58 }
 0x1ee   : > { %1691 = vrot.lane.b32.xlu0 %v4135_v55, %s3191_s9  ;;  %v4139_v44 = vpop.permute.xlu1 %1677 }
 0x1ef   : > { %2951 = vmatpush3.bf16.msra.mxu1 %v3124_v58  ;;  %v3126_v58 = vld [vmem:[%s5165_s2 + $0x30] sm:$0xff]  }
 0x1f0   : > { %v4144_v5 = vpop.permute.xlu0 %1967  ;;  %1285 = vrot.lane.b32.xlu1 %v3690_v23, %s3190_s8 }
 0x1f1   : > { %5308 = vst [vmem:[#allocation73_spill] sm:$0xff] %v4144_v5  ;;  %v5312_v5 = vrot.slane %v3305_v41, 7 }
 0x1f2   : > { %1279 = vrot.lane.b32.xlu0 %v4135_v55, %s3190_s8  ;;  %v4152_v8 = vpop.permute.xlu1 %1265 }
 0x1f4   : > { %v4157_v1 = vpop.permute.xlu0 %1139  ;;  %1977 = vrot.lane.b32.xlu1 %v1108_v49, %s3193_s11  ;;  %v3125_v49 = vld [vmem:[%s5165_s2 + $0x28] sm:$0xff]  }
 0x1f5   : > { %2952 = vmatprep.subr.bf16.mxu1 %v3125_v49 }
 0x1f6   : > { %1507 = vrot.lane.b32.xlu0 %v3694_v37, %s3192_s10  ;;  %v4164_v19 = vpop.permute.xlu1 %1141  ;;  %2953 = vmatpush3.bf16.msra.mxu1 %v3125_v49 }
 0x1f7   : > { %2954 = vmatprep.subr.bf16.mxu1 %v3126_v58 }
 0x1f8   : > { %v4166_v55 = vpop.permute.xlu0 %1963  ;;  %1697 = vrot.lane.b32.xlu1 %v3690_v23, %s3191_s9  ;;  %v5313_v23 = vrot.slane %v4160_v28, 7 }
 0x1f9   : > { %5310 = vst [vmem:[#allocation75_spill] sm:$0xff] %v4166_v55 }
 0x1fa   : > { %1159 = vrot.lane.b32.xlu0 %v3694_v37, %s3187_s26  ;;  %v4173_v63 = vpop.permute.xlu1 %1965  ;;  %2955 = vmatpush3.bf16.msra.mxu1 %v3126_v58 }
 0x1fb   : > { %5311 = vst [vmem:[#allocation76_spill] sm:$0xff] %v4173_v63  ;;  %v769_v63 = vsel %vm737_vm0, %v5313_v23, %v5312_v5  ;;  %2956 = vmatprep.subr.bf16.mxu1 %v3127_v53 }
 0x1fc   : > { %v4178_v48 = vpop.permute.xlu0 %1487  ;;  %1693 = vrot.lane.b32.xlu1 %v3700_v11, %s3191_s9  ;;  %v4204_v41 = vsel %vm802_vm3, %v769_v63, 0.0 }
 0x1fe   : > { %1983 = vrot.lane.b32.xlu0 %v3694_v37, %s3193_s11  ;;  %v4193_v55 = vpop.permute.xlu1 %1489  ;;  %v1112_v37 = vsel %vm1062_vm2, %v3578_v29, 0.0  ;;  %2957 = vmatpush3.bf16.msra.mxu1 %v3127_v53  ;;  %v1110_v53 = vsel %vm1062_vm2, %v3712_v14, 0.0 }
 0x200   : > { %v4198_v3 = vpop.permute.xlu0 %1267  ;;  %1281 = vrot.lane.b32.xlu1 %v3700_v11, %s3190_s8 }
 0x202   : > { %1255 = vrot.lane.b32.xlu0 %v4204_v41, %s3190_s8  ;;  %v4208_v23 = vpop.permute.xlu1 %1373 }
 0x203   : > { %5314 = vst [vmem:[#allocation77_spill] sm:$0xff] %v4208_v23 }
 0x204   : > { %v4213_v5 = vpop.permute.xlu0 %1679  ;;  %1509 = vrot.lane.b32.xlu1 %v1112_v37, %s3192_s10 }
 0x206   : > { %1155 = vrot.lane.b32.xlu0 %v3706_v60, %s3187_s26  ;;  %v4218_v63 = vpop.permute.xlu1 %926 }
 0x207   : > { %5315 = vst [vmem:[#allocation78_spill] sm:$0xff] %v4218_v63 }
 0x208   : > { %v4220_v49 = vpop.permute.xlu0 %1371  ;;  %1161 = vrot.lane.b32.xlu1 %v1112_v37, %s3187_s26 }
 0x209   : > { %5316 = vst [vmem:[#allocation79_spill] sm:$0xff] %v4220_v49 }
 0x20a   : > { %1979 = vrot.lane.b32.xlu0 %v3706_v60, %s3193_s11  ;;  %v4225_v58 = vpop.permute.xlu1 %1817 }
 0x20b   : > { %5317 = vst [vmem:[#allocation80_spill] sm:$0xff] %v4225_v58  ;;  %v4243_v58 = vsel %vm802_vm3, %v3530_v45, 0.0  ;;  %v4262_v45 = vsel %vm802_vm3, %v3716_v54, 0.0  ;;  %v1015_v54 = vrot.slane %v3390_v18, 1 }
 0x20c   : > { %v4227_v29 = vpop.permute.xlu0 %924  ;;  %1985 = vrot.lane.b32.xlu1 %v1112_v37, %s3193_s11  ;;  %5320 = vst [vmem:[#allocation83_spill] sm:$0xff] %v4243_v58  ;;  %5323 = vst [vmem:[#allocation86_spill] sm:$0xff] %v4262_v45 }
 0x20d   : > { %5318 = vst [vmem:[#allocation81_spill] sm:$0xff] %v4227_v29  ;;  %v5328_v29 = vld [vmem:[#allocation3_spill] sm:$0xff] }
 0x20e   : > { %1503 = vrot.lane.b32.xlu0 %v3706_v60, %s3192_s10  ;;  %v4232_v28 = vpop.permute.xlu1 %922  ;;  %v602_v11 = vadd.f32 %v5328_v29, %v3297_v25 }
 0x210   : > { %v4237_v23 = vpop.permute.xlu0 %1815  ;;  %1157 = vrot.lane.b32.xlu1 %v1110_v53, %s3187_s26 }
 0x211   : > { %5319 = vst [vmem:[#allocation82_spill] sm:$0xff] %v4237_v23 }
 0x212   : > { %1699 = vrot.lane.b32.xlu0 %v4243_v58, %s3191_s9  ;;  %v4247_v37 = vpop.permute.xlu1 %1813 }
 0x213   : > { %5321 = vst [vmem:[#allocation84_spill] sm:$0xff] %v4247_v37 }
 0x214   : > { %v4249_v60 = vpop.permute.xlu0 %920  ;;  %1981 = vrot.lane.b32.xlu1 %v1110_v53, %s3193_s11 }
 0x216   : > { %1287 = vrot.lane.b32.xlu0 %v4243_v58, %s3190_s8  ;;  %v4254_v14 = vpop.permute.xlu1 %1369 }
 0x218   : > { %v4256_v23 = vpop.permute.xlu0 %1811  ;;  %1505 = vrot.lane.b32.xlu1 %v1110_v53, %s3192_s10 }
 0x219   : > { %5322 = vst [vmem:[#allocation85_spill] sm:$0xff] %v4256_v23 }
 0x21a   : > { %1283 = vrot.lane.b32.xlu0 %v4262_v45, %s3190_s8  ;;  %v4266_v49 = vpop.permute.xlu1 %1493 }
 0x21b   : > { %5324 = vst [vmem:[#allocation87_spill] sm:$0xff] %v4266_v49  ;;  %v4301_v49 = vmax.f32 %v602_v11, 0.0 }
 0x21c   : > { %v4268_v37 = vpop.permute.xlu0 %1367  ;;  %942 = vrot.lane.b32.xlu1 %v3390_v18, %s3186_s13 }
 0x21d   : > { %5325 = vst [vmem:[#allocation88_spill] sm:$0xff] %v4268_v37 }
 0x21e   : > { %1695 = vrot.lane.b32.xlu0 %v4262_v45, %s3191_s9  ;;  %v4274_v58 = vpop.permute.xlu1 %1145  ;;  %v5329_v45 = vrot.slane %v3520_v7, 1 }
 0x220   : > { %v4276_v53 = vpop.permute.xlu0 %1683  ;;  %1513 = vrot.lane.b32.xlu1 %v3638_v13, %s3192_s10  ;;  %v1040_v13 = vsel %vm1028_vm1, %v1015_v54, %v5329_v45 }
 0x221   : > { %5326 = vst [vmem:[#allocation89_spill] sm:$0xff] %v4276_v53 }
 0x222   : > { %940 = vrot.lane.b32.xlu0 %v3358_v9, %s3186_s13  ;;  %v4283_v23 = vpop.permute.xlu1 %1277 }
 0x223   : > { %5327 = vst [vmem:[#allocation90_spill] sm:$0xff] %v4283_v23  ;;  %v1116_v23 = vsel %vm1062_vm2, %v1040_v13, 0.0 }
 0x224   : > { %v4287_v63 = vpop.permute.xlu0 %1271  ;;  %946 = vrot.lane.b32.xlu1 %v3765_v12, %s3186_s13 }
 0x226   : > { %1511 = vrot.lane.b32.xlu0 %v3406_v26, %s3192_s10  ;;  %v4297_v53 = vpop.permute.xlu1 %1969  ;;  %v5223_v26 = vrot.slane %v4301_v49, 1 }
 0x227   : > { %5330 = vst [vmem:[#allocation3_spill] sm:$0xff] %v4297_v53  ;;  %v5334_v53 = vrot.slane %v3358_v9, 1 }
 0x228   : > { %v4303_v25 = vpop.permute.xlu0 %1499  ;;  %1517 = vrot.lane.b32.xlu1 %v1116_v23, %s3192_s10 }
 0x229   : > { %5331 = vst [vmem:[#allocation91_spill] sm:$0xff] %v4303_v25  ;;  %v1041_v11 = vsel %vm1028_vm1, %v5334_v53, %v1015_v54 }
 0x22a   : > { %944 = vrot.lane.b32.xlu0 %v3520_v7, %s3186_s13  ;;  %v4308_v29 = vpop.permute.xlu1 %1689 }
 0x22b   : > { %5332 = vst [vmem:[#allocation92_spill] sm:$0xff] %v4308_v29 }
 0x22c   : > { %v4310_v45 = vpop.permute.xlu0 %1151  ;;  %1169 = vrot.lane.b32.xlu1 %v1116_v23, %s3187_s26 }
 0x22d   : > { %5333 = vst [vmem:[#allocation93_spill] sm:$0xff] %v4310_v45  ;;  %v5337_v45 = vrot.slane %v3765_v12, 1 }
 0x22e   : > { %1515 = vrot.lane.b32.xlu0 %v1041_v11, %s3192_s10  ;;  %v4319_v13 = vpop.permute.xlu1 %1685 }
 0x22f   : > { %5335 = vst [vmem:[#allocation94_spill] sm:$0xff] %v4319_v13  ;;  %v1038_v29 = vsel %vm1028_vm1, %v5337_v45, %v5223_v26  ;;  %v4358_v26 = vsel %vm802_vm3, %v3586_v30, 0.0  ;;  %v5346_v30 = vrot.slane %v3771_v21, 7 }
 0x230   : > { %v4321_v25 = vpop.permute.xlu0 %1975  ;;  %1705 = vrot.lane.b32.xlu1 %v3597_v43, %s3191_s9  ;;  %v1118_v53 = vsel %vm1062_vm2, %v1038_v29, 0.0  ;;  %5342 = vst [vmem:[#allocation100_spill] sm:$0xff] %v4358_v26 }
 0x231   : > { %5336 = vst [vmem:[#allocation95_spill] sm:$0xff] %v4321_v25 }
 0x232   : > { %1167 = vrot.lane.b32.xlu0 %v1041_v11, %s3187_s26  ;;  %v4332_v37 = vpop.permute.xlu1 %1273 }
 0x234   : > { %v4336_v54 = vpop.permute.xlu0 %1147  ;;  %1173 = vrot.lane.b32.xlu1 %v1118_v53, %s3187_s26 }
 0x235   : > { %5338 = vst [vmem:[#allocation96_spill] sm:$0xff] %v4336_v54  ;;  %v5375_v54 = vld [vmem:[#allocation32_spill] sm:$0xff] }
 0x236   : > { %1703 = vrot.lane.b32.xlu0 %v3661_v17, %s3191_s9  ;;  %v4341_v43 = vpop.permute.xlu1 %1149 }
 0x238   : > { %v4343_v25 = vpop.permute.xlu0 %1971  ;;  %1709 = vrot.lane.b32.xlu1 %v3805_v34, %s3191_s9 }
 0x239   : > { %5339 = vst [vmem:[#allocation97_spill] sm:$0xff] %v4343_v25  ;;  %v727_v25 = vrot.slane %v4301_v49, 7 }
 0x23a   : > { %1171 = vrot.lane.b32.xlu0 %v3813_v0, %s3187_s26  ;;  %v4349_v45 = vpop.permute.xlu1 %1973 }
 0x23b   : > { %5340 = vst [vmem:[#allocation98_spill] sm:$0xff] %v4349_v45  ;;  %v4377_v45 = vsel %vm737_vm0, %v727_v25, %v5346_v30 }
 0x23c   : > { %v4351_v29 = vpop.permute.xlu0 %1495  ;;  %1297 = vrot.lane.b32.xlu1 %v3805_v34, %s3190_s8 }
 0x23d   : > { %5341 = vst [vmem:[#allocation99_spill] sm:$0xff] %v4351_v29 }
 0x23e   : > { %1707 = vrot.lane.b32.xlu0 %v4358_v26, %s3191_s9  ;;  %v4362_v17 = vpop.permute.xlu1 %1497 }
 0x23f   : > { %5343 = vst [vmem:[#allocation101_spill] sm:$0xff] %v4362_v17 }
 0x240   : > { %v4365_v13 = vpop.permute.xlu0 %1275  ;;  %1833 = vrot.lane.b32.xlu1 %v3390_v18, %s3189_s30 }
 0x241   : > { %5344 = vst [vmem:[#allocation102_spill] sm:$0xff] %v4365_v13 }
 0x242   : > { %1295 = vrot.lane.b32.xlu0 %v4358_v26, %s3190_s8  ;;  %v4371_v34 = vpop.permute.xlu1 %1381  ;;  %v5349_v26 = vrot.slane %v3765_v12, 7 }
 0x243   : > { %5345 = vst [vmem:[#allocation103_spill] sm:$0xff] %v4371_v34 }
 0x244   : > { %v4379_v29 = vpop.permute.xlu0 %1687  ;;  %1301 = vrot.lane.b32.xlu1 %v4377_v45, %s3190_s8  ;;  %v747_v34 = vsel %vm737_vm0, %v5349_v26, %v727_v25 }
 0x245   : > { %5347 = vst [vmem:[#allocation104_spill] sm:$0xff] %v4379_v29  ;;  %v4397_v30 = vsel %vm802_vm3, %v747_v34, 0.0 }
 0x246   : > { %1831 = vrot.lane.b32.xlu0 %v3358_v9, %s3189_s30  ;;  %v4385_v18 = vpop.permute.xlu1 %934 }
 0x247   : > { %5348 = vst [vmem:[#allocation105_spill] sm:$0xff] %v4385_v18 }
 0x248   : > { %v4391_v13 = vpop.permute.xlu0 %1379  ;;  %1837 = vrot.lane.b32.xlu1 %v3765_v12, %s3189_s30 }
 0x249   : > { %5350 = vst [vmem:[#allocation106_spill] sm:$0xff] %v4391_v13  ;;  %v3152_v13 = vld [vmem:[%s5167_s4] ss:$0 sm:$0xff] }
 0x24a   : > { %1299 = vrot.lane.b32.xlu0 %v4397_v30, %s3190_s8  ;;  %v4401_v9 = vpop.permute.xlu1 %1825 }
 0x24b   : > { %5351 = vst [vmem:[#allocation107_spill] sm:$0xff] %v4401_v9 }
 0x24c   : > { %v4403_v18 = vpop.permute.xlu0 %932  ;;  %1393 = vrot.lane.b32.xlu1 %v3765_v12, %s3188_s29 }
 0x24d   : > { %5352 = vst [vmem:[#allocation108_spill] sm:$0xff] %v4403_v18 }
 0x24e   : > { %1835 = vrot.lane.b32.xlu0 %v3520_v7, %s3189_s30  ;;  %v4409_v25 = vpop.permute.xlu1 %930 }
 0x24f   : > { %5353 = vst [vmem:[#allocation109_spill] sm:$0xff] %v4409_v25 }
 0x250   : > { %v4411_v26 = vpop.permute.xlu0 %1823  ;;  %1993 = vrot.lane.b32.xlu1 %v1116_v23, %s3193_s11 }
 0x251   : > { %5354 = vst [vmem:[#allocation110_spill] sm:$0xff] %v4411_v26 }
 0x252   : > { %1391 = vrot.lane.b32.xlu0 %v3520_v7, %s3188_s29  ;;  %v4416_v34 = vpop.permute.xlu1 %1821 }
 0x253   : > { %5355 = vst [vmem:[#allocation111_spill] sm:$0xff] %v4416_v34 }
 0x254   : > { %v4418_v9 = vpop.permute.xlu0 %928  ;;  %1397 = vrot.lane.b32.xlu1 %v3771_v21, %s3188_s29 }
 0x255   : > { %5356 = vst [vmem:[#allocation112_spill] sm:$0xff] %v4418_v9 }
 0x256   : > { %1991 = vrot.lane.b32.xlu0 %v1041_v11, %s3193_s11  ;;  %v4423_v12 = vpop.permute.xlu1 %1377 }
 0x257   : > { %5357 = vst [vmem:[#allocation113_spill] sm:$0xff] %v4423_v12 }
 0x258   : > { %v4425_v18 = vpop.permute.xlu0 %1819  ;;  %1997 = vrot.lane.b32.xlu1 %v1118_v53, %s3193_s11 }
 0x259   : > { %5358 = vst [vmem:[#allocation114_spill] sm:$0xff] %v4425_v18  ;;  %v5363_v18 = vld [vmem:[#allocation7_spill] sm:$0xff] }
 0x25a   : > { %1395 = vrot.lane.b32.xlu0 %v4301_v49, %s3188_s29  ;;  %v4430_v23 = vpop.permute.xlu1 %1501  ;;  %v618_v34 = vadd.f32 %v3152_v13, %v5363_v18  ;;  %v966_v18 = vadd.f32 %v3844_v20, %v4204_v41  ;;  %v5370_v41 = vld [vmem:[#allocation21_spill] sm:$0xff] }
 0x25b   : > { %5359 = vst [vmem:[#allocation115_spill] sm:$0xff] %v4430_v23  ;;  %v5367_v23 = vld [vmem:[#allocation26_spill] sm:$0xff] }
 0x25c   : > { %v4432_v7 = vpop.permute.xlu0 %1375  ;;  %950 = vrot.lane.b32.xlu1 %v3771_v21, %s3186_s13 }
 0x25d   : > { %5360 = vst [vmem:[#allocation116_spill] sm:$0xff] %v4432_v7  ;;  %v3080_v7 = vunpack.i.h.bf16 %v3747_v10 }
 0x25e   : > { %1995 = vrot.lane.b32.xlu0 %v3813_v0, %s3193_s11  ;;  %v4438_v11 = vpop.permute.xlu1 %1153 }
 0x25f   : > { %5361 = vst [vmem:[#allocation117_spill] sm:$0xff] %v4438_v11 }
 0x260   : > { %v4440_v26 = vpop.permute.xlu0 %1691  ;;  %1521 = vrot.lane.b32.xlu1 %v1118_v53, %s3192_s10  ;;  %v3169_v53 = vadd.high.f32.bf16 %v3080_v7, %v3740_v35 }
 0x261   : > { %5362 = vst [vmem:[#allocation118_spill] sm:$0xff] %v4440_v26  ;;  %v4456_v26 = vmax.f32 %v618_v34, 0.0 }
 0x262   : > { %948 = vrot.lane.b32.xlu0 %v4301_v49, %s3186_s13  ;;  %v4450_v12 = vpop.permute.xlu1 %1285  ;;  %v1320_v34 = vadd.f32 %v3169_v53, %v3970_v6  ;;  %v5373_v53 = vld [vmem:[#allocation13_spill] sm:$0xff] }
 0x263   : > { %5364 = vst [vmem:[#allocation7_spill] sm:$0xff] %v4450_v12  ;;  %v4468_v12 = vsel %vm1062_vm2, %v5367_v23, 0.0  ;;  %v1022_v23 = vrot.slane %v4456_v26, 1 }
 0x264   : > { %v4452_v9 = vpop.permute.xlu0 %1279  ;;  %954 = vrot.lane.b32.xlu1 %v3834_v61, %s3186_s13  ;;  %v1416_v17 = vadd.f32 %v5375_v54, %v1320_v34 }
 0x265   : > { %5365 = vst [vmem:[#allocation119_spill] sm:$0xff] %v4452_v9  ;;  %v5368_v9 = vld [vmem:[#allocation5_spill] sm:$0xff] }
 0x266   : > { %1519 = vrot.lane.b32.xlu0 %v3813_v0, %s3192_s10  ;;  %v4461_v13 = vpop.permute.xlu1 %1977  ;;  %v967_v11 = vadd.f32 %v3948_v27, %v5368_v9  ;;  %v1193_v0 = vadd.f32 %v3982_v2, %v966_v18  ;;  %v5372_v27 = vld [vmem:[#allocation22_spill] sm:$0xff]  ;;  %v5376_v18 = vrot.slane %v3771_v21, 1  ;;  %v1544_v34 = vadd.f32 %v4007_v15, %v1416_v17 }
 0x267   : > { %5366 = vst [vmem:[#allocation120_spill] sm:$0xff] %v4461_v13  ;;  %v5371_v13 = vld [vmem:[#allocation4_spill] sm:$0xff] }
 0x268   : > { %v4473_v25 = vpop.permute.xlu0 %1507  ;;  %1525 = vrot.lane.b32.xlu1 %v4468_v12, %s3192_s10  ;;  %v1194_v7 = vadd.f32 %v4000_v42, %v967_v11  ;;  %v969_v9 = vadd.f32 %v5372_v27, %v5371_v13  ;;  %v1321_v6 = vadd.f32 %v4017_v31, %v1193_v0  ;;  %v3079_v42 = vunpack.i.l.bf16 %v3747_v10  ;;  %v5379_v27 = vld [vmem:[#allocation18_spill] sm:$0xff] }
 0x269   : > { %5369 = vst [vmem:[#allocation26_spill] sm:$0xff] %v4473_v25  ;;  %v5374_v25 = vld [vmem:[#allocation20_spill] sm:$0xff]  ;;  %v5377_v13 = vrot.slane %v4301_v49, 1 }
 0x26a   : > { %952 = vrot.lane.b32.xlu0 %v5370_v41, %s3186_s13  ;;  %v4481_v20 = vpop.permute.xlu1 %1697  ;;  %v968_v29 = vadd.f32 %v5374_v25, %v5373_v53  ;;  %v1196_v11 = vadd.f32 %v4092_v40, %v969_v9  ;;  %v1322_v54 = vadd.f32 %v3944_v38, %v1194_v7  ;;  %v5378_v40 = vrot.slane %v3834_v61, 1  ;;  %v5380_v53 = vld [vmem:[#allocation9_spill] sm:$0xff] }
 0x26b   : > { %v4502_v31 = vsel %vm1028_vm1, %v5377_v13, %v5376_v18  ;;  %v1417_v9 = vadd.f32 %v5379_v27, %v1321_v6  ;;  %v3170_v17 = vadd.low.f32.bf16 %v3079_v42, %v3740_v35  ;;  %v1736_v7 = vadd.f32 %v3952_v39, %v1544_v34  ;;  %v5381_v18 = vld [vmem:[#allocation17_spill] sm:$0xff]  ;;  %v5383_v35 = vld [vmem:[#allocation8_spill] sm:$0xff] }
 0x26c   : > { %v4490_v2 = vpop.permute.xlu0 %1159  ;;  %1177 = vrot.lane.b32.xlu1 %v4468_v12, %s3187_s26  ;;  %v1195_v25 = vadd.f32 %v3964_v4, %v968_v29  ;;  %v1034_v0 = vsel %vm1028_vm1, %v5378_v40, %v1022_v23  ;;  %v1324_v4 = vadd.f32 %v4152_v8, %v1196_v11  ;;  %v971_v6 = vadd.f32 %v4060_v33, %v5380_v53  ;;  %v5384_v27 = vld [vmem:[#allocation24_spill] sm:$0xff]  ;;  %v5389_v53 = vld [vmem:[#allocation71_spill] sm:$0xff] }
 0x26d   : > { %v4527_v15 = vsel %vm1062_vm2, %v1034_v0, 0.0  ;;  %v970_v8 = vadd.f32 %v4070_v52, %v5381_v18  ;;  %v973_v42 = vadd.f32 %v4041_v62, %v5383_v35  ;;  %v1545_v39 = vadd.f32 %v3956_v32, %v1417_v9  ;;  %v5385_v9 = vld [vmem:[#allocation68_spill] sm:$0xff]  ;;  %v5393_v35 = vld [vmem:[#allocation11_spill] sm:$0xff] }
 0x26e   : > { %1523 = vrot.lane.b32.xlu0 %v4502_v31, %s3192_s10  ;;  %v4509_v10 = vpop.permute.xlu1 %1693  ;;  %v1323_v38 = vadd.f32 %v4105_v16, %v1195_v25  ;;  %v5382_v16 = vld [vmem:[#allocation19_spill] sm:$0xff]  ;;  %v972_v25 = vadd.f32 %v4050_v22, %v3886_v24  ;;  %v1420_v33 = vadd.f32 %v4076_v59, %v1324_v4 }
 0x26f   : > { %v1418_v11 = vadd.f32 %v5382_v16, %v1322_v54  ;;  %v1197_v52 = vadd.f32 %v4157_v1, %v970_v8  ;;  %v1198_v54 = vadd.f32 %v4164_v19, %v971_v6  ;;  %v1737_v62 = vadd.f32 %v4094_v50, %v1545_v39  ;;  %v5390_v6 = vld [vmem:[#allocation54_spill] sm:$0xff]  ;;  %v5391_v8 = vld [vmem:[#allocation69_spill] sm:$0xff] }
 0x270   : > { %v4520_v29 = vpop.permute.xlu0 %1983  ;;  %1713 = vrot.lane.b32.xlu1 %v4377_v45, %s3191_s9  ;;  %v1419_v40 = vadd.f32 %v4086_v51, %v1323_v38  ;;  %v1548_v24 = vadd.f32 %v4193_v55, %v1420_v33  ;;  %v1200_v32 = vadd.f32 %v4274_v58, %v973_v42  ;;  %v1199_v51 = vadd.f32 %v4129_v47, %v972_v25  ;;  %v5386_v38 = vld [vmem:[#allocation33_spill] sm:$0xff]  ;;  %v5392_v16 = vld [vmem:[#allocation62_spill] sm:$0xff] }
 0x271   : > { %v1546_v34 = vadd.f32 %v4084_v57, %v1418_v11  ;;  %v1325_v57 = vadd.f32 %v4198_v3, %v1197_v52  ;;  %v1864_v58 = vadd.f32 %v5384_v27, %v1736_v7  ;;  %v1326_v4 = vadd.f32 %v5385_v9, %v1198_v54  ;;  %v5394_v25 = vld [vmem:[#allocation34_spill] sm:$0xff]  ;;  %v5401_v27 = vld [vmem:[#allocation63_spill] sm:$0xff] }
 0x272   : > { %1175 = vrot.lane.b32.xlu0 %v4502_v31, %s3187_s26  ;;  %v4537_v13 = vpop.permute.xlu1 %1281  ;;  %v1547_v59 = vadd.f32 %v4178_v48, %v1419_v40  ;;  %v1328_v50 = vadd.f32 %v4332_v37, %v1200_v32  ;;  %v1327_v7 = vadd.f32 %v4287_v63, %v1199_v51  ;;  %v975_v42 = vadd.f32 %v4232_v28, %v5393_v35  ;;  %v5396_v54 = vld [vmem:[#allocation66_spill] sm:$0xff]  ;;  %v5411_v35 = vld [vmem:[#allocation3_spill] sm:$0xff] }
 0x273   : > { %v1738_v19 = vadd.f32 %v4139_v44, %v1546_v34  ;;  %v5388_v44 = vld [vmem:[#allocation67_spill] sm:$0xff]  ;;  %v1421_v11 = vadd.f32 %v5392_v16, %v1325_v57  ;;  %v731_v33 = vrot.slane %v4456_v26, 7  ;;  %v5410_v16 = vld [vmem:[#allocation78_spill] sm:$0xff] }
 0x274   : > { %v1256_v0 = vpop.permute.xlu0 %1255  ;;  %1181 = vrot.lane.b32.xlu1 %v4527_v15, %s3187_s26  ;;  %v1739_v48 = vadd.f32 %v4213_v5, %v1547_v59  ;;  %v1865_v37 = vadd.f32 %v5388_v44, %v1737_v62  ;;  %v2024_v5 = vadd.f32 %v5391_v8, %v1864_v58  ;;  %v5395_v34 = vld [vmem:[#allocation75_spill] sm:$0xff]  ;;  %v1424_v40 = vadd.f32 %v4254_v14, %v1328_v50  ;;  %v5400_v59 = vld [vmem:[#allocation60_spill] sm:$0xff]  ;;  %v5403_v50 = vld [vmem:[#allocation101_spill] sm:$0xff] }
 0x275   : > { %v1319_v22 = vadd.f32 %v3170_v17, %v1256_v0  ;;  %v5387_v17 = vld [vmem:[#allocation28_spill] sm:$0xff]  ;;  %v1866_v63 = vadd.f32 %v5396_v54, %v1738_v19  ;;  %v5397_v0 = vld [vmem:[#allocation59_spill] sm:$0xff]  ;;  %v1422_v57 = vadd.f32 %v5400_v59, %v1326_v4  ;;  %v1202_v51 = vadd.f32 %v4341_v43, %v975_v42  ;;  %v5407_v4 = vld [vmem:[#allocation70_spill] sm:$0xff] }
 0x276   : > { %1711 = vrot.lane.b32.xlu0 %v4397_v30, %s3191_s9  ;;  %v4558_v1 = vpop.permute.xlu1 %1509  ;;  %v4574_v47 = vsel %vm802_vm3, %v5387_v17, 0.0  ;;  %v2025_v52 = vadd.f32 %v5395_v34, %v1865_v37  ;;  %v5402_v58 = vld [vmem:[#allocation88_spill] sm:$0xff]  ;;  %v1552_v9 = vadd.f32 %v5403_v50, %v1424_v40  ;;  %v5404_v17 = vld [vmem:[#allocation23_spill] sm:$0xff]  ;;  %v5413_v40 = vld [vmem:[#allocation50_spill] sm:$0xff] }
 0x277   : > { %v1415_v55 = vadd.f32 %v3872_v56, %v1319_v22  ;;  %v1740_v56 = vadd.f32 %v5389_v53, %v1548_v24  ;;  %v5398_v24 = vld [vmem:[#allocation65_spill] sm:$0xff]  ;;  %v5399_v22 = vld [vmem:[#allocation52_spill] sm:$0xff]  ;;  %v1423_v14 = vadd.f32 %v5402_v58, %v1327_v7  ;;  %v5412_v34 = vld [vmem:[#allocation99_spill] sm:$0xff] }
 0x278   : > { %v4567_v3 = vpop.permute.xlu0 %1155  ;;  %1717 = vrot.lane.b32.xlu1 %v5386_v38, %s3191_s9  ;;  %v1867_v32 = vadd.f32 %v5398_v24, %v1739_v48  ;;  %v974_v28 = vadd.f32 %v4249_v60, %v5399_v22  ;;  %v5405_v44 = vld [vmem:[#allocation76_spill] sm:$0xff]  ;;  %v5406_v60 = vld [vmem:[#allocation87_spill] sm:$0xff]  ;;  %v5415_v24 = vld [vmem:[#allocation94_spill] sm:$0xff] }
 0x279   : > { %v1543_v18 = vadd.f32 %v5390_v6, %v1415_v55  ;;  %v1868_v19 = vadd.f32 %v5401_v27, %v1740_v56  ;;  %v2026_v37 = vadd.f32 %v5405_v44, %v1866_v63  ;;  %v1550_v53 = vadd.f32 %v5406_v60, %v1422_v57  ;;  %v5408_v43 = vld [vmem:[#allocation96_spill] sm:$0xff]  ;;  %v5409_v56 = vld [vmem:[#allocation10_spill] sm:$0xff]  ;;  %v5421_v44 = vld [vmem:[#allocation109_spill] sm:$0xff] }
 0x27a   : > { %1179 = vrot.lane.b32.xlu0 %v5394_v25, %s3187_s26  ;;  %v4586_v39 = vpop.permute.xlu1 %1161  ;;  %v1549_v6 = vadd.f32 %v5407_v4, %v1421_v11  ;;  %v977_v7 = vadd.f32 %v5410_v16, %v5409_v56  ;;  %v1551_v54 = vadd.f32 %v5412_v34, %v1423_v14  ;;  %v5416_v22 = vld [vmem:[#allocation90_spill] sm:$0xff]  ;;  %v5418_v58 = vld [vmem:[#allocation92_spill] sm:$0xff]  ;;  %v5422_v4 = vld [vmem:[#allocation89_spill] sm:$0xff] }
 0x27b   : > { %v1735_v62 = vadd.f32 %v5397_v0, %v1543_v18  ;;  %v1201_v18 = vadd.f32 %v5408_v43, %v974_v28  ;;  %v2028_v42 = vadd.f32 %v5411_v35, %v1868_v19  ;;  %v5414_v0 = vld [vmem:[#allocation73_spill] sm:$0xff]  ;;  %v1742_v11 = vadd.f32 %v5415_v24, %v1550_v53  ;;  %v5417_v59 = vld [vmem:[#allocation102_spill] sm:$0xff]  ;;  %v5419_v19 = vld [vmem:[#allocation104_spill] sm:$0xff] }
 0x27c   : > { %v4598_v55 = vpop.permute.xlu0 %1979  ;;  %1305 = vrot.lane.b32.xlu1 %v5386_v38, %s3190_s8  ;;  %v1330_v28 = vadd.f32 %v5416_v22, %v1202_v51  ;;  %v1744_v50 = vadd.f32 %v5418_v58, %v1552_v9  ;;  %v5420_v14 = vld [vmem:[#allocation16_spill] sm:$0xff]  ;;  %v1741_v53 = vadd.f32 %v5422_v4, %v1549_v6  ;;  %v5423_v43 = vld [vmem:[#allocation29_spill] sm:$0xff]  ;;  %v5425_v9 = vrot.slane %v3834_v61, 7 }
 0x27d   : > { %v1863_v48 = vadd.f32 %v5404_v17, %v1735_v62  ;;  %v2027_v62 = vadd.f32 %v5414_v0, %v1867_v32  ;;  %v1329_v57 = vadd.f32 %v5417_v59, %v1201_v18  ;;  %v1743_v17 = vadd.f32 %v5419_v19, %v1551_v54  ;;  %v5426_v16 = vld [vmem:[#allocation64_spill] sm:$0xff]  ;;  %v5428_v6 = vld [vmem:[#allocation117_spill] sm:$0xff] }
 0x27e   : > { %1715 = vrot.lane.b32.xlu0 %v4574_v47, %s3191_s9  ;;  %v4612_v8 = vpop.permute.xlu1 %1985  ;;  %v2056_v32 = vpack.c.bf16 %v2026_v37, %v2025_v52  ;;  %v5424_v18 = vrot.slane %v5423_v43, 7  ;;  %v743_v56 = vsel %vm737_vm0, %v5425_v9, %v731_v33  ;;  %v1204_v35 = vadd.f32 %v5428_v6, %v977_v7  ;;  %v5429_v54 = vld [vmem:[#allocation84_spill] sm:$0xff]  ;;  %v5431_v24 = vld [vmem:[#allocation77_spill] sm:$0xff]  ;;  %v5434_v7 = vld [vmem:[#allocation7_spill] sm:$0xff] }
 0x27f   : > { %v2023_v63 = vadd.f32 %v5413_v40, %v1863_v48  ;;  %v979_v48 = vadd.f32 %v5421_v44, %v5420_v14  ;;  %v2057_v37 = vpack.c.bf16 %v2028_v42, %v2027_v62  ;;  %v1870_v40 = vadd.f32 %v5429_v54, %v1742_v11  ;;  %v5433_v19 = vld [vmem:[#allocation80_spill] sm:$0xff]  ;;  %v5435_v44 = vld [vmem:[#allocation85_spill] sm:$0xff]  ;;  %v5445_v54 = vld [vmem:[#allocation119_spill] sm:$0xff] }
 0x280   : > { %v4623_v27 = vpop.permute.xlu0 %1503  ;;  %1841 = vrot.lane.b32.xlu1 %v3771_v21, %s3189_s30  ;;  %v4638_v21 = vsel %vm737_vm0, %v731_v33, %v5424_v18  ;;  %v1426_v22 = vadd.f32 %v5431_v24, %v1330_v28  ;;  %v5432_v33 = vld [vmem:[#allocation82_spill] sm:$0xff]  ;;  %v1872_v14 = vadd.f32 %v5433_v19, %v1744_v50  ;;  %v1332_v42 = vadd.f32 %v4537_v13, %v1204_v35  ;;  %v5440_v50 = vld [vmem:[#allocation103_spill] sm:$0xff]  ;;  %v5441_v13 = vld [vmem:[#allocation97_spill] sm:$0xff] }
 0x281   : > { %v2055_v60 = vpack.c.bf16 %v2024_v5, %v2023_v63  ;;  %v5427_v5 = vld [vmem:[#allocation81_spill] sm:$0xff]  ;;  %v5430_v63 = vld [vmem:[#allocation79_spill] sm:$0xff]  ;;  %v1871_v58 = vadd.f32 %v5432_v33, %v1743_v17  ;;  %v1869_v11 = vadd.f32 %v5435_v44, %v1741_v53  ;;  %v5439_v17 = vld [vmem:[#allocation120_spill] sm:$0xff] }
 0x282   : > { %1303 = vrot.lane.b32.xlu0 %v4574_v47, %s3190_s8  ;;  %v1158_v51 = vpop.permute.xlu1 %1157  ;;  %v976_v52 = vadd.f32 %v5427_v5, %v5426_v16  ;;  %v1425_v0 = vadd.f32 %v5430_v63, %v1329_v57  ;;  %v2032_v18 = vadd.f32 %v5439_v17, %v1872_v14  ;;  %v5442_v5 = vld [vmem:[#allocation91_spill] sm:$0xff]  ;;  %v5444_v35 = vld [vmem:[#allocation112_spill] sm:$0xff] }
 0x283   : > { %v1206_v34 = vadd.f32 %v1158_v51, %v979_v48  ;;  %2958 = vmatprep.mubr.bf16.mxu1 %v2055_v60  ;;  %v5436_v48 = vld [vmem:[#allocation98_spill] sm:$0xff]  ;;  %v5437_v60 = vld [vmem:[#allocation115_spill] sm:$0xff]  ;;  %v2029_v16 = vadd.f32 %v5441_v13, %v1869_v11 }
 0x284   : > { %v1700_v59 = vpop.permute.xlu0 %1699  ;;  %1309 = vrot.lane.b32.xlu1 %v4638_v21, %s3190_s8  ;;  %2959 = vmatmul.mubr.bf16.vlgmr.msra.gmra.mrb[16].mxu1 %v2056_v32  ;;  %v2030_v57 = vadd.f32 %v5436_v48, %v1870_v40  ;;  %v1554_v28 = vadd.f32 %v5437_v60, %v1426_v22  ;;  %v5438_v32 = vld [vmem:[#allocation93_spill] sm:$0xff]  ;;  %v5446_v63 = vld [vmem:[#allocation95_spill] sm:$0xff] }
 0x285   : > { %v1334_v62 = vadd.f32 %v5434_v7, %v1206_v34  ;;  %2962 = vmatprep.mubr.bf16.mxu1 %v2057_v37  ;;  %v1203_v51 = vadd.f32 %v5438_v32, %v976_v52  ;;  %v1553_v37 = vadd.f32 %v5442_v5, %v1425_v0  ;;  %v5443_v52 = vld [vmem:[#allocation72_spill] sm:$0xff]  ;;  %v2031_v24 = vadd.f32 %v5446_v63, %v1871_v58  ;;  %v5447_v22 = vld [vmem:[#allocation113_spill] sm:$0xff]  ;;  %v5449_v11 = vld [vmem:[#allocation111_spill] sm:$0xff] }
 0x286   : > { %1839 = vrot.lane.b32.xlu0 %v4301_v49, %s3189_s30  ;;  %v1982_v4 = vpop.permute.xlu1 %1981  ;;  %v1746_v53 = vadd.f32 %v4509_v10, %v1554_v28  ;;  %v4673_v49 = vsel %vm802_vm3, %v743_v56, 0.0  ;;  %v978_v34 = vadd.f32 %v5444_v35, %v5443_v52  ;;  %v1428_v0 = vadd.f32 %v5447_v22, %v1332_v42  ;;  %v5448_v10 = vld [vmem:[#allocation118_spill] sm:$0xff]  ;;  %v5450_v58 = vld [vmem:[#allocation116_spill] sm:$0xff]  ;;  %v5458_v22 = vld [vmem:[#allocation45_spill] sm:$0xff] }
 0x287   : > { %v1430_v9 = vadd.f32 %v5440_v50, %v1334_v62  ;;  %v1331_v40 = vadd.f32 %v5445_v54, %v1203_v51  ;;  %v2058_v33 = vpack.c.bf16 %v2030_v57, %v2029_v16  ;;  %v1745_v19 = vadd.f32 %v5448_v10, %v1553_v37  ;;  %v5451_v32 = vld [vmem:[#allocation114_spill] sm:$0xff] }
 0x288   : > { %v4667_v6 = vpop.permute.xlu0 %1287  ;;  %1845 = vrot.lane.b32.xlu1 %v3834_v61, %s3189_s30  ;;  %v2059_v7 = vpack.c.bf16 %v2032_v18, %v2031_v24  ;;  %v1205_v56 = vadd.f32 %v4567_v3, %v978_v34  ;;  %v1874_v48 = vadd.f32 %v5449_v11, %v1746_v53  ;;  %v5452_v18 = vld [vmem:[#allocation51_spill] sm:$0xff]  ;;  %v5456_v34 = vld [vmem:[#allocation110_spill] sm:$0xff] }
 0x289   : > { %v1558_v62 = vadd.f32 %v4558_v1, %v1430_v9  ;;  %v1427_v42 = vadd.f32 %v5450_v58, %v1331_v40  ;;  %v1873_v51 = vadd.f32 %v5451_v32, %v1745_v19  ;;  %v5457_v40 = vld [vmem:[#allocation41_spill] sm:$0xff]  ;;  %v5460_v19 = vld [vmem:[#allocation58_spill] sm:$0xff]  ;;  %v5462_v58 = vld [vmem:[#allocation35_spill] sm:$0xff] }
 0x28a   : > { %1307 = vrot.lane.b32.xlu0 %v4673_v49, %s3190_s8  ;;  %v1506_v14 = vpop.permute.xlu1 %1505  ;;  %v2034_v17 = vadd.f32 %v1982_v4, %v1874_v48  ;;  %v5455_v4 = vld [vmem:[#allocation26_spill] sm:$0xff]  ;;  %v5461_v48 = vld [vmem:[#allocation37_spill] sm:$0xff] }
 0x28b   : > { %v1556_v44 = vadd.f32 %v1506_v14, %v1428_v0  ;;  %v1555_v3 = vadd.f32 %v4623_v27, %v1427_v42  ;;  %v1750_v50 = vadd.f32 %v5452_v18, %v1558_v62  ;;  %v2033_v13 = vadd.f32 %v4598_v55, %v1873_v51 }
 0x28c   : > { %v1284_v60 = vpop.permute.xlu0 %1283  ;;  %1401 = vrot.lane.b32.xlu1 %v3834_v61, %s3188_s29  ;;  %2963 = vmatmul.mubr.bf16.gmra.mrb[20].mxu1 %v2058_v33  ;;  %v5453_v61 = vld [vmem:[#allocation106_spill] sm:$0xff]  ;;  %v5459_v33 = vld [vmem:[#allocation56_spill] sm:$0xff]  ;;  %v4751_v42 = vsel %vm1062_vm2, %v5462_v58, 0.0  ;;  %v5477_v58 = vld [vmem:[#allocation39_spill] sm:$0xff] }
 0x28d   : > { %v1748_v57 = vadd.f32 %v4481_v20, %v1556_v44  ;;  %v1333_v28 = vadd.f32 %v1284_v60, %v1205_v56  ;;  %2966 = vmatprep.mubr.bf16.mxu1 %v2059_v7  ;;  %v5454_v20 = vld [vmem:[#allocation107_spill] sm:$0xff]  ;;  %v2060_v52 = vpack.c.bf16 %v2034_v17, %v2033_v13  ;;  %v1878_v55 = vadd.f32 %v5457_v40, %v1750_v50  ;;  %v5465_v50 = vld [vmem:[#allocation25_spill] sm:$0xff] }
 0x28e   : > { %1843 = vrot.lane.b32.xlu0 %v5370_v41, %s3189_s30  ;;  %v4693_v1 = vpop.permute.xlu1 %942 }
 0x28f   : > { %v1429_v9 = vadd.f32 %v5453_v61, %v1333_v28  ;;  %v1876_v5 = vadd.f32 %v5454_v20, %v1748_v57  ;;  %v2038_v14 = vadd.f32 %v5460_v19, %v1878_v55  ;;  %v5463_v57 = vld [vmem:[#allocation30_spill] sm:$0xff] }
 0x290   : > { %v1696_v16 = vpop.permute.xlu0 %1695  ;;  %2001 = vrot.lane.b32.xlu1 %v4468_v12, %s3193_s11 }
 0x291   : > { %v1557_v37 = vadd.f32 %v5455_v4, %v1429_v9  ;;  %v1747_v53 = vadd.f32 %v1696_v16, %v1555_v3  ;;  %v2036_v24 = vadd.f32 %v4612_v8, %v1876_v5  ;;  %v5466_v9 = vld [vmem:[#allocation42_spill] sm:$0xff]  ;;  %v5467_v5 = vld [vmem:[#allocation15_spill] sm:$0xff]  ;;  %v5468_v4 = vld [vmem:[#allocation105_spill] sm:$0xff] }
 0x292   : > { %1399 = vrot.lane.b32.xlu0 %v5370_v41, %s3188_s29  ;;  %v4705_v27 = vpop.permute.xlu1 %1513 }
 0x293   : > { %v1749_v35 = vadd.f32 %v1700_v59, %v1557_v37  ;;  %v1875_v54 = vadd.f32 %v5456_v34, %v1747_v53  ;;  %v981_v37 = vadd.f32 %v5468_v4, %v5467_v5  ;;  %v5470_v34 = vld [vmem:[#allocation86_spill] sm:$0xff]  ;;  %v5482_v4 = vld [vmem:[#allocation48_spill] sm:$0xff] }
 0x294   : > { %v4709_v63 = vpop.permute.xlu0 %940  ;;  %1405 = vrot.lane.b32.xlu1 %v5423_v43, %s3188_s29  ;;  %2967 = vmatmul.mubr.bf16.gmra.mrb[24].mxu1 %v2060_v52 }
 0x295   : > { %v2035_v12 = vadd.f32 %v4520_v29, %v1875_v54  ;;  %v1877_v0 = vadd.f32 %v5458_v22, %v1749_v35  ;;  %v5469_v35 = vld [vmem:[#allocation43_spill] sm:$0xff]  ;;  %v5471_v54 = vld [vmem:[#allocation108_spill] sm:$0xff]  ;;  %v1208_v55 = vadd.f32 %v4586_v39, %v981_v37  ;;  %v5475_v39 = vld [vmem:[#allocation38_spill] sm:$0xff] }
 0x296   : > { %1999 = vrot.lane.b32.xlu0 %v4502_v31, %s3193_s11  ;;  %v947_v41 = vpop.permute.xlu1 %946  ;;  %v980_v40 = vadd.f32 %v5471_v54, %v5470_v34  ;;  %v5473_v22 = vld [vmem:[#allocation44_spill] sm:$0xff]  ;;  %v3128_v34 = vld [vmem:[%s5166_s3] sm:$0xff]  }
 0x297   : > { %v2061_v59 = vpack.c.bf16 %v2036_v24, %v2035_v12  ;;  %v2037_v10 = vadd.f32 %v5459_v33, %v1877_v0  ;;  %v987_v61 = vadd.f32 %v947_v41, %v5465_v50  ;;  %v5472_v12 = vld [vmem:[#allocation100_spill] sm:$0xff]  ;;  %2990 = vmatprep.subr.bf16.mxu0 %v3128_v34 }
 0x298   : > { %v4720_v7 = vpop.permute.xlu0 %1511  ;;  %2005 = vrot.lane.b32.xlu1 %v4527_v15, %s3193_s11  ;;  %v1207_v41 = vadd.f32 %v4490_v2, %v980_v40  ;;  %v5479_v50 = vld [vmem:[#allocation40_spill] sm:$0xff]  ;;  %v5483_v40 = vld [vmem:[#allocation55_spill] sm:$0xff]  ;;  %2991 = vmatpush3.bf16.msra.mxu0 %v3128_v34 }
 0x299   : > { %2970 = vmatprep.mubr.bf16.mxu1 %v2061_v59  ;;  %v2062_v29 = vpack.c.bf16 %v2038_v14, %v2037_v10  ;;  %v5474_v10 = vld [vmem:[#allocation53_spill] sm:$0xff] }
 0x29a   : > { %1403 = vrot.lane.b32.xlu0 %v4456_v26, %s3188_s29  ;;  %v4726_v8 = vpop.permute.xlu1 %1517  ;;  %v1336_v19 = vadd.f32 %v5474_v10, %v1208_v55  ;;  %v1335_v14 = vadd.f32 %v4667_v6, %v1207_v41  ;;  %v5478_v6 = vld [vmem:[#allocation83_spill] sm:$0xff] }
 0x29c   : > { %v945_v56 = vpop.permute.xlu0 %944  ;;  %958 = vrot.lane.b32.xlu1 %v5423_v43, %s3186_s13  ;;  %2971 = vmatmul.mubr.bf16.gmra.mrb[28].mxu1 %v2062_v29  ;;  %v1431_v37 = vadd.f32 %v5482_v4, %v1335_v14  ;;  %v5488_v14 = vld [vmem:[#allocation49_spill] sm:$0xff] }
 0x29d   : > { %v986_v24 = vadd.f32 %v945_v56, %v5472_v12  ;;  %v4815_v56 = vsel %vm802_vm3, %v5475_v39, 0.0 }
 0x29e   : > { %2003 = vrot.lane.b32.xlu0 %v5394_v25, %s3193_s11  ;;  %v4732_v31 = vpop.permute.xlu1 %1169  ;;  %v1559_v12 = vadd.f32 %v4720_v7, %v1431_v37 }
 0x2a0   : > { %v4734_v62 = vpop.permute.xlu0 %1515  ;;  %1529 = vrot.lane.b32.xlu1 %v4527_v15, %s3192_s10 }
 0x2a2   : > { %956 = vrot.lane.b32.xlu0 %v4456_v26, %s3186_s13  ;;  %v4740_v44 = vpop.permute.xlu1 %1705 }
 0x2a4   : > { %v4742_v11 = vpop.permute.xlu0 %1167  ;;  %962 = vrot.lane.b32.xlu1 %v5461_v48, %s3186_s13 }
 0x2a6   : > { %1527 = vrot.lane.b32.xlu0 %v5394_v25, %s3192_s10  ;;  %v1174_v60 = vpop.permute.xlu1 %1173  ;;  %v5464_v25 = vrot.slane %v5423_v43, 1 }
 0x2a7   : > { %v1214_v16 = vadd.f32 %v1174_v60, %v987_v61  ;;  %v5476_v60 = vld [vmem:[#allocation6_spill] sm:$0xff]  ;;  %v982_v61 = vadd.f32 %v5479_v50, %v5478_v6 }
 0x2a8   : > { %v1704_v15 = vpop.permute.xlu0 %1703  ;;  %1533 = vrot.lane.b32.xlu1 %v4751_v42, %s3192_s10  ;;  %v4767_v51 = vsel %vm1028_vm1, %v1022_v23, %v5464_v25  ;;  %v4783_v23 = vsel %vm1062_vm2, %v5466_v9, 0.0  ;;  %v5480_v9 = vld [vmem:[#allocation57_spill] sm:$0xff] }
 0x2a9   : > { %v1209_v55 = vadd.f32 %v5483_v40, %v982_v61 }
 0x2aa   : > { %960 = vrot.lane.b32.xlu0 %v5463_v57, %s3186_s13  ;;  %v4757_v28 = vpop.permute.xlu1 %1709  ;;  %s2821_s13 = sshll.u32 %s5500_s25, 8 }
 0x2ab   : > { %s5079_s21 = scalar_lea.vmem %s5170_s7, %s2821_s13 }
 0x2ac   : > { %v1172_v32 = vpop.permute.xlu0 %1171  ;;  %1185 = vrot.lane.b32.xlu1 %v4751_v42, %s3187_s26 }
 0x2ad   : > { %v1213_v59 = vadd.f32 %v1172_v32, %v986_v24  ;;  %v983_v32 = vadd.f32 %v5477_v58, %v5476_v60  ;;  %v5484_v24 = vld [vmem:[#allocation74_spill] sm:$0xff]  ;;  %v1751_v58 = vadd.f32 %v1704_v15, %v1559_v12  ;;  %v5491_v15 = vld [vmem:[#allocation31_spill] sm:$0xff] }
 0x2ae   : > { %1531 = vrot.lane.b32.xlu0 %v4767_v51, %s3192_s10  ;;  %v4771_v17 = vpop.permute.xlu1 %1297  ;;  %v5485_v41 = vrot.slane %v5484_v24, 7 }
 0x2b0   : > { %v4773_v3 = vpop.permute.xlu0 %1707  ;;  %1721 = vrot.lane.b32.xlu1 %v4638_v21, %s3191_s9 }
 0x2b2   : > { %1183 = vrot.lane.b32.xlu0 %v4767_v51, %s3187_s26  ;;  %v1834_v18 = vpop.permute.xlu1 %1833 }
 0x2b4   : > { %v4785_v13 = vpop.permute.xlu0 %1295  ;;  %1189 = vrot.lane.b32.xlu1 %v4783_v23, %s3187_s26 }
 0x2b6   : > { %1719 = vrot.lane.b32.xlu0 %v4673_v49, %s3191_s9  ;;  %v1302_v20 = vpop.permute.xlu1 %1301 }
 0x2b7   : > { %v4793_v53 = vadd.f32 %v1302_v20, %v1214_v16  ;;  %v1210_v16 = vadd.f32 %v5480_v9, %v983_v32  ;;  %v5481_v20 = vld [vmem:[#allocation47_spill] sm:$0xff] }
 0x2b8   : > { %v1832_v52 = vpop.permute.xlu0 %1831  ;;  %1725 = vrot.lane.b32.xlu1 %v5469_v35, %s3191_s9  ;;  %v1432_v5 = vadd.f32 %v5481_v20, %v1336_v19  ;;  %v3129_v32 = vld [vmem:[%s5166_s3 + $0x8] sm:$0xff]  }
 0x2b9   : > { %v1338_v39 = vadd.f32 %v5488_v14, %v1210_v16  ;;  %v1879_v61 = vadd.f32 %v1832_v52, %v1751_v58  ;;  %2992 = vmatprep.subr.bf16.mxu0 %v3129_v32  ;;  %v5490_v16 = vld [vmem:[#allocation46_spill] sm:$0xff] }
 0x2ba   : > { %1187 = vrot.lane.b32.xlu0 %v5473_v22, %s3187_s26  ;;  %v4803_v0 = vpop.permute.xlu1 %1837  ;;  %2993 = vmatpush3.bf16.msra.mxu0 %v3129_v32 }
 0x2bb   : > { %v1434_v20 = vadd.f32 %v5491_v15, %v1338_v39 }
 0x2bc   : > { %v1300_v33 = vpop.permute.xlu0 %1299  ;;  %1313 = vrot.lane.b32.xlu1 %v5469_v35, %s3190_s8 }
 0x2bd   : > { %v4810_v29 = vadd.f32 %v1300_v33, %v1213_v59  ;;  %v5486_v59 = vld [vmem:[#allocation36_spill] sm:$0xff]  ;;  %v1562_v52 = vadd.f32 %v4726_v8, %v1434_v20  ;;  %v3131_v8 = vld [vmem:[%s5166_s3 + $0x18] sm:$0xff]  }
 0x2be   : > { %1723 = vrot.lane.b32.xlu0 %v4815_v56, %s3191_s9  ;;  %v4819_v2 = vpop.permute.xlu1 %1393  ;;  %v5487_v33 = vrot.slane %v5486_v59, 7 }
 0x2c0   : > { %v1836_v25 = vpop.permute.xlu0 %1835  ;;  %1849 = vrot.lane.b32.xlu1 %v5423_v43, %s3189_s30  ;;  %v1560_v43 = vadd.f32 %v4705_v27, %v1432_v5  ;;  %v4844_v10 = vsel %vm737_vm0, %v5487_v33, %v5485_v41  ;;  %v5489_v27 = vld [vmem:[#allocation61_spill] sm:$0xff]  ;;  %v5492_v5 = vld [vmem:[#allocation27_spill] sm:$0xff] }
 0x2c1   : > { %v1337_v60 = vadd.f32 %v5489_v27, %v1209_v55  ;;  %v3130_v55 = vld [vmem:[%s5166_s3 + $0x10] sm:$0xff]   ;;  %v3132_v27 = vld [vmem:[%s5166_s3 + $0x20] sm:$0xff]  }
 0x2c2   : > { %1311 = vrot.lane.b32.xlu0 %v4815_v56, %s3190_s8  ;;  %v1994_v54 = vpop.permute.xlu1 %1993  ;;  %v1752_v7 = vadd.f32 %v4740_v44, %v1560_v43  ;;  %v4865_v44 = vsel %vm802_vm3, %v5490_v16, 0.0  ;;  %2994 = vmatprep.subr.bf16.mxu0 %v3130_v55  ;;  %v3134_v16 = vld [vmem:[%s5166_s3 + $0x30] sm:$0xff]  }
 0x2c3   : > { %v1433_v4 = vadd.f32 %v5492_v5, %v1337_v60  ;;  %2995 = vmatpush3.bf16.msra.mxu0 %v3130_v55  ;;  %v1027_v60 = vrot.slane %v5484_v24, 1  ;;  %v5496_v55 = vmov 0.0  }
 0x2c4   : > { %v4846_v19 = vpop.permute.xlu0 %1391  ;;  %1317 = vrot.lane.b32.xlu1 %v4844_v10, %s3190_s8  ;;  %v1880_v50 = vadd.f32 %v1834_v18, %v1752_v7  ;;  %2996 = vmatprep.subr.bf16.mxu0 %v3131_v8 }
 0x2c5   : > { %v1561_v34 = vadd.f32 %v4734_v62, %v1433_v4 }
 0x2c6   : > { %1847 = vrot.lane.b32.xlu0 %v4456_v26, %s3189_s30  ;;  %v4858_v6 = vpop.permute.xlu1 %1397  ;;  %v2040_v26 = vadd.f32 %v1994_v54, %v1880_v50  ;;  %v1754_v54 = vadd.f32 %v4757_v28, %v1562_v52 }
 0x2c7   : > { %v1753_v12 = vadd.f32 %v4773_v3, %v1561_v34  ;;  %2997 = vmatpush3.bf16.msra.mxu0 %v3131_v8 }
 0x2c8   : > { %v1992_v9 = vpop.permute.xlu0 %1991  ;;  %1853 = vrot.lane.b32.xlu1 %v5461_v48, %s3189_s30  ;;  %v1882_v41 = vadd.f32 %v4803_v0, %v1754_v54  ;;  %2998 = vmatprep.subr.bf16.mxu0 %v3132_v27 }
 0x2c9   : > { %v2039_v37 = vadd.f32 %v1992_v9, %v1879_v61  ;;  %v1881_v33 = vadd.f32 %v1836_v25, %v1753_v12 }
 0x2ca   : > { %1315 = vrot.lane.b32.xlu0 %v4865_v44, %s3190_s8  ;;  %v1998_v18 = vpop.permute.xlu1 %1997 }
 0x2cb   : > { %v2063_v40 = vpack.c.bf16 %v2040_v26, %v2039_v37  ;;  %v2042_v28 = vadd.f32 %v1998_v18, %v1882_v41  ;;  %2999 = vmatpush3.bf16.msra.mxu0 %v3132_v27  ;;  %v5495_v18 = vrot.slane %v5486_v59, 1 }
 0x2cc   : > { %v4876_v43 = vpop.permute.xlu0 %1395  ;;  %1409 = vrot.lane.b32.xlu1 %v5461_v48, %s3188_s29 }
 0x2cd   : > { %2974 = vmatprep.mubr.bf16.mxu1 %v2063_v40  ;;  %v1029_v52 = vsel %vm1028_vm1, %v5495_v18, %v1027_v60 }
 0x2ce   : > { %1851 = vrot.lane.b32.xlu0 %v5463_v57, %s3189_s30  ;;  %v951_v62 = vpop.permute.xlu1 %950 }
 0x2cf   : > { %v989_v61 = vadd.f32 %v951_v62, %v4377_v45 }
 0x2d0   : > { %v1996_v48 = vpop.permute.xlu0 %1995  ;;  %2009 = vrot.lane.b32.xlu1 %v4751_v42, %s3193_s11  ;;  %v3133_v42 = vld [vmem:[%s5166_s3 + $0x28] sm:$0xff]  }
 0x2d1   : > { %v2041_v3 = vadd.f32 %v1996_v48, %v1881_v33  ;;  %3000 = vmatprep.subr.bf16.mxu0 %v3133_v42 }
 0x2d2   : > { %1407 = vrot.lane.b32.xlu0 %v5463_v57, %s3188_s29  ;;  %v4892_v14 = vpop.permute.xlu1 %1521  ;;  %3001 = vmatpush3.bf16.msra.mxu0 %v3133_v42 }
 0x2d3   : > { %v2064_v39 = vpack.c.bf16 %v2042_v28, %v2041_v3  ;;  %3002 = vmatprep.subr.bf16.mxu0 %v3134_v16  ;;  %v5497_v28 = vld [vmem:[#allocation12_spill] sm:$0xff] }
 0x2d4   : > { %v949_v0 = vpop.permute.xlu0 %948  ;;  %1413 = vrot.lane.b32.xlu1 %v5484_v24, %s3188_s29  ;;  %v985_v3 = vadd.f32 %v4693_v1, %v5497_v28 }
 0x2d5   : > { %2975 = vmatmul.mubr.bf16.gmra.mrb[32].mxu1 %v2064_v39  ;;  %v988_v4 = vadd.f32 %v949_v0, %v4397_v30  ;;  %v5498_v39 = vld [vmem:[#allocation14_spill] sm:$0xff] }
 0x2d6   : > { %2007 = vrot.lane.b32.xlu0 %v4767_v51, %s3193_s11  ;;  %v955_v57 = vpop.permute.xlu1 %954  ;;  %v5493_v51 = vld [vmem:[#allocation2_spill] sm:$0xff]  ;;  %3003 = vmatpush3.bf16.msra.mxu0 %v3134_v16  ;;  %v1212_v0 = vadd.f32 %v4732_v31, %v985_v3 }
 0x2d7   : > { %v5494_v32 = vrot.slane %v5493_v51, 1  ;;  %v991_v46 = vadd.f32 %v955_v57, %v5386_v38 }
 0x2d8   : > { %v4904_v25 = vpop.permute.xlu0 %1519  ;;  %2013 = vrot.lane.b32.xlu1 %v4783_v23, %s3193_s11 }
 0x2d9   : > { %v1060_v50 = vsel %vm1028_vm1, %v1027_v60, %v5494_v32 }
 0x2da   : > { %1411 = vrot.lane.b32.xlu0 %v5486_v59, %s3188_s29  ;;  %v4911_v7 = vpop.permute.xlu1 %1525  ;;  %v1478_v20 = vsel %vm1062_vm2, %v1060_v50, 0.0 }
 0x2dc   : > { %v953_v58 = vpop.permute.xlu0 %952  ;;  %1537 = vrot.lane.b32.xlu1 %v4783_v23, %s3192_s10  ;;  %v3135_v23 = vld [vmem:[%s5166_s3 + $0x38] sm:$0xff]  }
 0x2dd   : > { %3004 = vmatprep.subr.bf16.mxu0 %v3135_v23  ;;  %v990_v38 = vadd.f32 %v953_v58, %v4574_v47  ;;  %v1340_v58 = vadd.f32 %v4771_v17, %v1212_v0  ;;  %v1438_v17 = vadd.f32 %v4858_v6, %v4793_v53 }
 0x2de   : > { %2011 = vrot.lane.b32.xlu0 %v5473_v22, %s3193_s11  ;;  %v1178_v9 = vpop.permute.xlu1 %1177  ;;  %3005 = vmatpush3.bf16.msra.mxu0 %v3135_v23 }
 0x2df   : > { %v1216_v15 = vadd.f32 %v1178_v9, %v989_v61  ;;  %v1436_v50 = vadd.f32 %v4819_v2, %v1340_v58 }
 0x2e0   : > { %v4930_v5 = vpop.permute.xlu0 %1523  ;;  %1541 = vrot.lane.b32.xlu1 %v1478_v20, %s3192_s10 }
 0x2e2   : > { %1535 = vrot.lane.b32.xlu0 %v5473_v22, %s3192_s10  ;;  %v1714_v45 = vpop.permute.xlu1 %1713 }
 0x2e4   : > { %v1176_v26 = vpop.permute.xlu0 %1175  ;;  %1729 = vrot.lane.b32.xlu1 %v4844_v10, %s3191_s9 }
 0x2e5   : > { %v1215_v37 = vadd.f32 %v1176_v26, %v988_v4 }
 0x2e6   : > { %1539 = vrot.lane.b32.xlu0 %v1029_v52, %s3192_s10  ;;  %v1182_v22 = vpop.permute.xlu1 %1181 }
 0x2e7   : > { %v1218_v34 = vadd.f32 %v1182_v22, %v991_v46 }
 0x2e8   : > { %v1712_v40 = vpop.permute.xlu0 %1711  ;;  %1855 = vrot.lane.b32.xlu1 %v5486_v59, %s3189_s30 }
 0x2ea   : > { %1727 = vrot.lane.b32.xlu0 %v4865_v44, %s3191_s9  ;;  %v1718_v30 = vpop.permute.xlu1 %1717 }
 0x2ec   : > { %v1180_v10 = vpop.permute.xlu0 %1179  ;;  %3087 = vrot.lane.b32.xlu1 %v5496_v55, %s3189_s30 }
 0x2ed   : > { %v1217_v36 = vadd.f32 %v1180_v10, %v990_v38 }
 0x2ee   : > { %3082 = vrot.lane.b32.xlu0 %v5496_v55, %s3191_s9  ;;  %v1306_v54 = vpop.permute.xlu1 %1305 }
 0x2ef   : > { %v4953_v12 = vadd.f32 %v1306_v54, %v1216_v15 }
 0x2f0   : > { %v1716_v8 = vpop.permute.xlu0 %1715  ;;  %2017 = vrot.lane.b32.xlu1 %v1478_v20, %s3193_s11 }
 0x2f2   : > { %1857 = vrot.lane.b32.xlu0 %v5484_v24, %s3189_s30  ;;  %v1842_v59 = vpop.permute.xlu1 %1841  ;;  %v984_v24 = vadd.f32 %v4709_v63, %v5498_v39  ;;  %v1564_v63 = vadd.f32 %v4892_v14, %v1436_v50  ;;  %v1566_v14 = vadd.f32 %v4911_v7, %v1438_v17 }
 0x2f4   : > { %v1304_v44 = vpop.permute.xlu0 %1303  ;;  %v1211_v42 = vadd.f32 %v4742_v11, %v984_v24  ;;  %v1756_v16 = vadd.f32 %v1714_v45, %v1564_v63 }
 0x2f5   : > { %v4958_v47 = vadd.f32 %v1304_v44, %v1215_v37  ;;  %v1758_v37 = vadd.f32 %v1718_v30, %v1566_v14 }
 0x2f6   : > { %2015 = vrot.lane.b32.xlu0 %v1029_v52, %s3193_s11  ;;  %v1310_v62 = vpop.permute.xlu1 %1309  ;;  %v1339_v51 = vadd.f32 %v4785_v13, %v1211_v42  ;;  %v1884_v20 = vadd.f32 %v1842_v59, %v1756_v16  ;;  %v1437_v13 = vadd.f32 %v4876_v43, %v4810_v29 }
 0x2f7   : > { %v4961_v41 = vadd.f32 %v1310_v62, %v1218_v34 }
 0x2f8   : > { %v1840_v33 = vpop.permute.xlu0 %1839  ;;  %v1435_v1 = vadd.f32 %v4846_v19, %v1339_v51 }
 0x2fa   : > { %3092 = vrot.lane.b32.xlu0 %v5496_v55, %s3193_s11  ;;  %v1846_v48 = vpop.permute.xlu1 %1845  ;;  %v1563_v9 = vadd.f32 %v4904_v25, %v1435_v1  ;;  %v1565_v25 = vadd.f32 %v4930_v5, %v1437_v13 }
 0x2fb   : > { %v1886_v22 = vadd.f32 %v1846_v48, %v1758_v37 }
 0x2fc   : > { %v1308_v27 = vpop.permute.xlu0 %1307  ;;  %v1755_v11 = vadd.f32 %v1712_v40, %v1563_v9  ;;  %v1757_v18 = vadd.f32 %v1716_v8, %v1565_v25 }
 0x2fd   : > { %v4971_v57 = vadd.f32 %v1308_v27, %v1217_v36 }
 0x2fe   : > { %v1402_v60 = vpop.permute.xlu1 %1401  ;;  %v1883_v23 = vadd.f32 %v1840_v33, %v1755_v11 }
 0x300   : > { %v1844_v32 = vpop.permute.xlu0 %1843 }
 0x301   : > { %v1885_v34 = vadd.f32 %v1844_v32, %v1757_v18  ;;  %v1440_v32 = vadd.f32 %v1402_v60, %v4953_v12 }
 0x302   : > { %v2002_v61 = vpop.permute.xlu1 %2001 }
 0x303   : > { %v2044_v2 = vadd.f32 %v2002_v61, %v1884_v20 }
 0x304   : > { %v1400_v31 = vpop.permute.xlu0 %1399 }
 0x305   : > { %v1439_v50 = vadd.f32 %v1400_v31, %v4958_v47 }
 0x306   : > { %v1406_v15 = vpop.permute.xlu1 %1405 }
 0x307   : > { %v1442_v13 = vadd.f32 %v1406_v15, %v4961_v41 }
 0x308   : > { %v2000_v4 = vpop.permute.xlu0 %1999 }
 0x309   : > { %v2043_v19 = vadd.f32 %v2000_v4, %v1883_v23 }
 0x30a   : > { %v2006_v26 = vpop.permute.xlu1 %2005 }
 0x30b   : > { %v2065_v46 = vpack.c.bf16 %v2044_v2, %v2043_v19  ;;  %v2046_v6 = vadd.f32 %v2006_v26, %v1886_v22 }
 0x30c   : > { %v1404_v45 = vpop.permute.xlu0 %1403 }
 0x30d   : > { %2978 = vmatprep.mubr.bf16.mxu1 %v2065_v46  ;;  %v1441_v2 = vadd.f32 %v1404_v45, %v4971_v57  ;;  %v5018_v57 = vld [vmem:[%s5168_s5] ss:$0 sm:$0xff] }
 0x30e   : > { %v4985_v52 = vpop.permute.xlu1 %958 }
 0x310   : > { %v2004_v53 = vpop.permute.xlu0 %2003 }
 0x311   : > { %v2045_v40 = vadd.f32 %v2004_v53, %v1885_v34 }
 0x312   : > { %v1530_v29 = vpop.permute.xlu1 %1529 }
 0x313   : > { %v2066_v43 = vpack.c.bf16 %v2046_v6, %v2045_v40  ;;  %v1568_v61 = vadd.f32 %v1530_v29, %v1440_v32 }
 0x314   : > { %v4987_v38 = vpop.permute.xlu0 %956 }
 0x315   : > { %2979 = vmatmul.mubr.bf16.gmra.mrb[36].mxu1 %v2066_v43 }
 0x316   : > { %v4989_v7 = vpop.permute.xlu1 %962 }
 0x318   : > { %v1528_v5 = vpop.permute.xlu0 %1527 }
 0x319   : > { %v1567_v63 = vadd.f32 %v1528_v5, %v1439_v50  ;;  %v995_v50 = vadd.f32 %v4989_v7, %v5469_v35 }
 0x31a   : > { %v1534_v10 = vpop.permute.xlu1 %1533 }
 0x31b   : > { %v1570_v60 = vadd.f32 %v1534_v10, %v1442_v13 }
 0x31c   : > { %v4991_v55 = vpop.permute.xlu0 %960 }
 0x31e   : > { %v4993_v30 = vpop.permute.xlu1 %1185 }
 0x320   : > { %v1532_v36 = vpop.permute.xlu0 %1531 }
 0x321   : > { %v1569_v47 = vadd.f32 %v1532_v36, %v1441_v2  ;;  %v993_v36 = vadd.f32 %v4985_v52, %v4638_v21  ;;  %v994_v21 = vadd.f32 %v4991_v55, %v4815_v56 }
 0x322   : > { %v1722_v54 = vpop.permute.xlu1 %1721 }
 0x323   : > { %v1760_v16 = vadd.f32 %v1722_v54, %v1568_v61  ;;  %v992_v54 = vadd.f32 %v4987_v38, %v4673_v49 }
 0x324   : > { %v1184_v8 = vpop.permute.xlu0 %1183 }
 0x326   : > { %v4995_v59 = vpop.permute.xlu1 %1189 }
 0x328   : > { %v1720_v44 = vpop.permute.xlu0 %1719 }
 0x329   : > { %v1759_v11 = vadd.f32 %v1720_v44, %v1567_v63 }
 0x32a   : > { %v1726_v62 = vpop.permute.xlu1 %1725 }
 0x32b   : > { %v1762_v25 = vadd.f32 %v1726_v62, %v1570_v60 }
 0x32c   : > { %v4997_v33 = vpop.permute.xlu0 %1187 }
 0x32e   : > { %v4999_v48 = vpop.permute.xlu1 %1313 }
 0x330   : > { %v1724_v28 = vpop.permute.xlu0 %1723 }
 0x331   : > { %v1761_v46 = vadd.f32 %v1724_v28, %v1569_v47 }
 0x332   : > { %v1850_v3 = vpop.permute.xlu1 %1849 }
 0x333   : > { %v1888_v23 = vadd.f32 %v1850_v3, %v1760_v16 }
 0x334   : > { %v5001_v39 = vpop.permute.xlu0 %1311 }
 0x336   : > { %v5003_v24 = vpop.permute.xlu1 %1317 }
 0x338   : > { %v1848_v27 = vpop.permute.xlu0 %1847 }
 0x339   : > { %v1887_v4 = vadd.f32 %v1848_v27, %v1759_v11  ;;  %v1220_v27 = vadd.f32 %v4993_v30, %v993_v36  ;;  %v1222_v30 = vadd.f32 %v4995_v59, %v995_v50  ;;  %v1221_v11 = vadd.f32 %v4997_v33, %v994_v21 }
 0x33a   : > { %v1854_v0 = vpop.permute.xlu1 %1853 }
 0x33b   : > { %v1890_v18 = vadd.f32 %v1854_v0, %v1762_v25  ;;  %v1219_v0 = vadd.f32 %v1184_v8, %v992_v54  ;;  %v1350_v56 = vadd.f32 %v5003_v24, %v1222_v30 }
 0x33c   : > { %v5005_v42 = vpop.permute.xlu0 %1315 }
 0x33d   : > { %v1347_v61 = vadd.f32 %v5001_v39, %v1219_v0  ;;  %v1349_v39 = vadd.f32 %v5005_v42, %v1221_v11 }
 0x33e   : > { %v5007_v58 = vpop.permute.xlu1 %1409 }
 0x340   : > { %v1852_v51 = vpop.permute.xlu0 %1851 }
 0x341   : > { %v1889_v22 = vadd.f32 %v1852_v51, %v1761_v46 }
 0x342   : > { %v2010_v1 = vpop.permute.xlu1 %2009 }
 0x343   : > { %v2048_v19 = vadd.f32 %v2010_v1, %v1888_v23  ;;  %v1348_v1 = vadd.f32 %v4999_v48, %v1220_v27 }
 0x344   : > { %v1408_v9 = vpop.permute.xlu0 %1407 }
 0x345   : > { %v1444_v23 = vadd.f32 %v5007_v58, %v1348_v1  ;;  %v1443_v35 = vadd.f32 %v1408_v9, %v1347_v61 }
 0x346   : > { %v5011_v20 = vpop.permute.xlu1 %1413 }
 0x347   : > { %v1446_v33 = vadd.f32 %v5011_v20, %v1350_v56 }
 0x348   : > { %v2008_v17 = vpop.permute.xlu0 %2007 }
 0x349   : > { %v2047_v26 = vadd.f32 %v2008_v17, %v1887_v4 }
 0x34a   : > { %v2014_v12 = vpop.permute.xlu1 %2013 }
 0x34b   : > { %v2067_v31 = vpack.c.bf16 %v2048_v19, %v2047_v26  ;;  %v2050_v53 = vadd.f32 %v2014_v12, %v1890_v18 }
 0x34c   : > { %v1412_v14 = vpop.permute.xlu0 %1411 }
 0x34d   : > { %2982 = vmatprep.mubr.bf16.mxu1 %v2067_v31  ;;  %v1445_v24 = vadd.f32 %v1412_v14, %v1349_v39 }
 0x34e   : > { %v1538_v37 = vpop.permute.xlu1 %1537 }
 0x34f   : > { %v1572_v13 = vadd.f32 %v1538_v37, %v1444_v23 }
 0x350   : > { %v2012_v34 = vpop.permute.xlu0 %2011 }
 0x351   : > { %v2049_v6 = vadd.f32 %v2012_v34, %v1889_v22 }
 0x352   : > { %v1542_v40 = vpop.permute.xlu1 %1541 }
 0x353   : > { %v2068_v41 = vpack.c.bf16 %v2050_v53, %v2049_v6  ;;  %v1574_v22 = vadd.f32 %v1542_v40, %v1446_v33 }
 0x354   : > { %v1536_v15 = vpop.permute.xlu0 %1535 }
 0x355   : > { %2983 = vmatmul.mubr.bf16.gmra.mrb[40].mxu1 %v2068_v41  ;;  %v1571_v2 = vadd.f32 %v1536_v15, %v1443_v35 }
 0x356   : > { %v1730_v45 = vpop.permute.xlu1 %1729 }
 0x357   : > { %v2960_v29 = vpop.f32.mrb[16].mxu1  ;;  %v1764_v12 = vadd.f32 %v1730_v45, %v1572_v13 }
 0x358   : > { %v2185_v43 = vadd.f32 %v2960_v29, %v5018_v57  ;;  %v1540_v5 = vpop.permute.xlu0 %1539  ;;  %v2176_v10 = vpop.f32.mrb[17].mxu1 }
 0x359   : > { %v2177_v44 = vadd.f32 %v5018_v57, %v2176_v10  ;;  %v2961_v62 = vpop.f32.mrb[18].mxu1  ;;  %v1573_v34 = vadd.f32 %v1540_v5, %v1445_v24 }
 0x35a   : > { %v2188_v28 = vadd.f32 %v2961_v62, %v5018_v57  ;;  %v2179_v3 = vpop.f32.mrb[19].mxu1  ;;  %v1856_v51 = vpop.permute.xlu1 %1855  ;;  %v2305_v52 = vmax.f32 %v2185_v43, 0.0 }
 0x35b   : > { %v2180_v32 = vadd.f32 %v5018_v57, %v2179_v3  ;;  %v2303_v63 = vmax.f32 %v2177_v44, 0.0 }
 0x35c   : > { %v2306_v49 = vmax.f32 %v2188_v28, 0.0  ;;  %v1728_v38 = vpop.permute.xlu0 %1727 }
 0x35d   : > { %v2304_v16 = vmax.f32 %v2180_v32, 0.0  ;;  %v1763_v60 = vadd.f32 %v1728_v38, %v1571_v2 }
 0x35e   : > { %v2336_v8 = vpack.c.bf16 %v2306_v49, %v2305_v52  ;;  %v3088_v19 = vpop.permute.xlu1 %3087 }
 0x35f   : > { %v2335_v7 = vpack.c.bf16 %v2304_v16, %v2303_v63  ;;  %v2964_v4 = vpop.f32.mrb[20].mxu1  ;;  %v1891_v15 = vadd.f32 %v1856_v51, %v1763_v60 }
 0x360   : > { %v2201_v55 = vadd.f32 %v2964_v4, %v5018_v57  ;;  %v3083_v17 = vpop.permute.xlu0 %3082  ;;  %v2192_v48 = vpop.f32.mrb[21].mxu1 }
 0x361   : > { %v2193_v59 = vadd.f32 %v5018_v57, %v2192_v48  ;;  %v2965_v26 = vpop.f32.mrb[22].mxu1  ;;  %3006 = vmatprep.mubr.bf16.mxu0 %v2335_v7  ;;  %v3171_v29 = vadd.low.f32.bf16 %v1573_v34, %v3083_v17  ;;  %v3172_v43 = vadd.high.f32.bf16 %v1574_v22, %v3083_v17 }
 0x362   : > { %v2204_v58 = vadd.f32 %v2965_v26, %v5018_v57  ;;  %v2195_v9 = vpop.f32.mrb[23].mxu1  ;;  %3007 = vmatmul.mubr.bf16.vlgmr.msra.gmra.mrb[16].mxu0 %v2336_v8  ;;  %v2309_v31 = vmax.f32 %v2201_v55, 0.0  ;;  %v2018_v6 = vpop.permute.xlu1 %2017 }
 0x363   : > { %v2196_v47 = vadd.f32 %v5018_v57, %v2195_v9  ;;  %v2307_v46 = vmax.f32 %v2193_v59, 0.0  ;;  %v3173_v32 = vadd.low.f32.bf16 %v3171_v29, %v3088_v19  ;;  %v3174_v50 = vadd.high.f32.bf16 %v3172_v43, %v3088_v19 }
 0x364   : > { %v2310_v42 = vmax.f32 %v2204_v58, 0.0  ;;  %v1858_v25 = vpop.permute.xlu0 %1857 }
 0x365   : > { %v2308_v37 = vmax.f32 %v2196_v47, 0.0  ;;  %v1892_v18 = vadd.f32 %v1858_v25, %v1764_v12 }
 0x366   : > { %v2338_v53 = vpack.c.bf16 %v2310_v42, %v2309_v31 }
 0x367   : > { %v2337_v20 = vpack.c.bf16 %v2308_v37, %v2307_v46  ;;  %v2968_v41 = vpop.f32.mrb[24].mxu1  ;;  %v2052_v36 = vadd.f32 %v2018_v6, %v1892_v18 }
 0x368   : > { %v2217_v14 = vadd.f32 %v2968_v41, %v5018_v57  ;;  %v2016_v45 = vpop.permute.xlu0 %2015  ;;  %v2208_v10 = vpop.f32.mrb[25].mxu1 }
 0x369   : > { %v2051_v54 = vadd.f32 %v2016_v45, %v1891_v15  ;;  %v2209_v44 = vadd.f32 %v5018_v57, %v2208_v10  ;;  %v2969_v62 = vpop.f32.mrb[26].mxu1  ;;  %3010 = vmatprep.mubr.bf16.mxu0 %v2337_v20 }
 0x36a   : > { %v2220_v40 = vadd.f32 %v2969_v62, %v5018_v57  ;;  %v2211_v5 = vpop.f32.mrb[27].mxu1  ;;  %3011 = vmatmul.mubr.bf16.gmra.mrb[20].mxu0 %v2338_v53  ;;  %v2313_v27 = vmax.f32 %v2217_v14, 0.0 }
 0x36b   : > { %v2069_v28 = vpack.c.bf16 %v2052_v36, %v2051_v54  ;;  %v2212_v3 = vadd.f32 %v5018_v57, %v2211_v5  ;;  %v2311_v21 = vmax.f32 %v2209_v44, 0.0 }
 0x36c   : > { %v2314_v0 = vmax.f32 %v2220_v40, 0.0  ;;  %v3093_v51 = vpop.permute.xlu0 %3092 }
 0x36d   : > { %v2312_v52 = vmax.f32 %v2212_v3, 0.0  ;;  %2986 = vmatprep.mubr.bf16.mxu1 %v2069_v28  ;;  %v3175_v1 = vadd.low.f32.bf16 %v3173_v32, %v3093_v51  ;;  %v3176_v61 = vadd.high.f32.bf16 %v3174_v50, %v3093_v51 }
 0x36e   : > { %v2340_v49 = vpack.c.bf16 %v2314_v0, %v2313_v27 }
 0x36f   : > { %v2339_v38 = vpack.c.bf16 %v2312_v52, %v2311_v21  ;;  %v2972_v63 = vpop.f32.mrb[28].mxu1  ;;  %v2070_v23 = vpack.c.bf16 %v3176_v61, %v3175_v1  ;;  %v5068_v21 = vld [vmem:[%s5169_s6] ss:$0 sm:$0xff]  ;;  %v3153_v52 = vld [vmem:[%s3257_s12 + $0x8] sm:$0xff]  }
 0x370   : > { %v2233_v16 = vadd.f32 %v2972_v63, %v5018_v57  ;;  %v2224_v30 = vpop.f32.mrb[29].mxu1 }
 0x371   : > { %v2225_v8 = vadd.f32 %v5018_v57, %v2224_v30  ;;  %v2973_v11 = vpop.f32.mrb[30].mxu1  ;;  %3014 = vmatprep.mubr.bf16.mxu0 %v2339_v38  ;;  %2987 = vmatmul.mubr.bf16.gmra.mrb[44].mxu1 %v2070_v23  ;;  %v3154_v38 = vld [vmem:[%s3257_s12] sm:$0xff]   ;;  %v2370_v30 = vunpack.c.h.bf16 %v3153_v52 }
 0x372   : > { %v2236_v35 = vadd.f32 %v2973_v11, %v5018_v57  ;;  %v2227_v7 = vpop.f32.mrb[31].mxu1  ;;  %3015 = vmatmul.mubr.bf16.gmra.mrb[24].mxu0 %v2340_v49  ;;  %v2317_v56 = vmax.f32 %v2233_v16, 0.0  ;;  %v2369_v49 = vunpack.c.l.bf16 %v3153_v52  ;;  %v2367_v1 = vunpack.c.l.bf16 %v3154_v38 }
 0x373   : > { %v2228_v4 = vadd.f32 %v5018_v57, %v2227_v7  ;;  %v2315_v17 = vmax.f32 %v2225_v8, 0.0  ;;  %v2368_v8 = vunpack.c.h.bf16 %v3154_v38 }
 0x374   : > { %v2318_v55 = vmax.f32 %v2236_v35, 0.0 }
 0x375   : > { %v2316_v48 = vmax.f32 %v2228_v4, 0.0 }
 0x376   : > { %v2342_v39 = vpack.c.bf16 %v2318_v55, %v2317_v56 }
 0x377   : > { %v2341_v13 = vpack.c.bf16 %v2316_v48, %v2315_v17 }
 0x379   : > { %3018 = vmatprep.mubr.bf16.mxu0 %v2341_v13 }
 0x37a   : > { %3019 = vmatmul.mubr.bf16.gmra.mrb[28].mxu0 %v2342_v39 }
 0x3a8   : > { %v2976_v2 = vpop.f32.mrb[32].mxu1 }
 0x3a9   : > { %v2249_v19 = vadd.f32 %v2976_v2, %v5018_v57  ;;  %v2240_v59 = vpop.f32.mrb[33].mxu1 }
 0x3aa   : > { %v2241_v26 = vadd.f32 %v5018_v57, %v2240_v59  ;;  %v2977_v33 = vpop.f32.mrb[34].mxu1 }
 0x3ab   : > { %v2252_v58 = vadd.f32 %v2977_v33, %v5018_v57  ;;  %v2243_v9 = vpop.f32.mrb[35].mxu1  ;;  %v2321_v12 = vmax.f32 %v2249_v19, 0.0  ;;  %v3155_v19 = vld [vmem:[%s3257_s12 + $0x18] sm:$0xff]  }
 0x3ac   : > { %v2244_v24 = vadd.f32 %v5018_v57, %v2243_v9  ;;  %v2319_v47 = vmax.f32 %v2241_v26, 0.0  ;;  %v2373_v59 = vunpack.c.l.bf16 %v3155_v19 }
 0x3ad   : > { %v2322_v60 = vmax.f32 %v2252_v58, 0.0  ;;  %v3156_v58 = vld [vmem:[%s3257_s12 + $0x10] sm:$0xff]  }
 0x3ae   : > { %v2320_v31 = vmax.f32 %v2244_v24, 0.0  ;;  %v2371_v9 = vunpack.c.l.bf16 %v3156_v58 }
 0x3af   : > { %v2344_v42 = vpack.c.bf16 %v2322_v60, %v2321_v12  ;;  %v2374_v60 = vunpack.c.h.bf16 %v3155_v19 }
 0x3b0   : > { %v2343_v25 = vpack.c.bf16 %v2320_v31, %v2319_v47 }
 0x3b2   : > { %3022 = vmatprep.mubr.bf16.mxu0 %v2343_v25 }
 0x3b3   : > { %3023 = vmatmul.mubr.bf16.gmra.mrb[32].mxu0 %v2344_v42  ;;  %v2372_v42 = vunpack.c.h.bf16 %v3156_v58 }
 0x3e8   : > { %v2980_v46 = vpop.f32.mrb[36].mxu1 }
 0x3e9   : > { %v2265_v37 = vadd.f32 %v2980_v46, %v5018_v57  ;;  %v2256_v18 = vpop.f32.mrb[37].mxu1 }
 0x3ea   : > { %v2257_v22 = vadd.f32 %v5018_v57, %v2256_v18  ;;  %v2981_v34 = vpop.f32.mrb[38].mxu1 }
 0x3eb   : > { %v2268_v53 = vadd.f32 %v2981_v34, %v5018_v57  ;;  %v2259_v6 = vpop.f32.mrb[39].mxu1  ;;  %v2325_v41 = vmax.f32 %v2265_v37, 0.0 }
 0x3ec   : > { %v2260_v20 = vadd.f32 %v5018_v57, %v2259_v6  ;;  %v2323_v29 = vmax.f32 %v2257_v22, 0.0 }
 0x3ed   : > { %v2326_v15 = vmax.f32 %v2268_v53, 0.0 }
 0x3ee   : > { %v2324_v43 = vmax.f32 %v2260_v20, 0.0 }
 0x3ef   : > { %v2346_v14 = vpack.c.bf16 %v2326_v15, %v2325_v41  ;;  %v3157_v15 = vld [vmem:[%s3257_s12 + $0x28] sm:$0xff]  }
 0x3f0   : > { %v2345_v45 = vpack.c.bf16 %v2324_v43, %v2323_v29  ;;  %v2377_v29 = vunpack.c.l.bf16 %v3157_v15 }
 0x3f2   : > { %3026 = vmatprep.mubr.bf16.mxu0 %v2345_v45  ;;  %v3158_v45 = vld [vmem:[%s3257_s12 + $0x20] sm:$0xff]  }
 0x3f3   : > { %3027 = vmatmul.mubr.bf16.gmra.mrb[36].mxu0 %v2346_v14 }
 0x428   : > { %v2984_v10 = vpop.f32.mrb[40].mxu1 }
 0x429   : > { %v2281_v36 = vadd.f32 %v2984_v10, %v5018_v57  ;;  %v2272_v54 = vpop.f32.mrb[41].mxu1  ;;  %v2375_v10 = vunpack.c.l.bf16 %v3158_v45 }
 0x42a   : > { %v2273_v44 = vadd.f32 %v5018_v57, %v2272_v54  ;;  %v2985_v62 = vpop.f32.mrb[42].mxu1 }
 0x42b   : > { %v2284_v40 = vadd.f32 %v2985_v62, %v5018_v57  ;;  %v2275_v5 = vpop.f32.mrb[43].mxu1  ;;  %v2329_v3 = vmax.f32 %v2281_v36, 0.0  ;;  %v2378_v62 = vunpack.c.h.bf16 %v3157_v15 }
 0x42c   : > { %v2276_v28 = vadd.f32 %v5018_v57, %v2275_v5  ;;  %v2327_v0 = vmax.f32 %v2273_v44, 0.0 }
 0x42d   : > { %v2330_v27 = vmax.f32 %v2284_v40, 0.0 }
 0x42e   : > { %v2328_v51 = vmax.f32 %v2276_v28, 0.0 }
 0x42f   : > { %v2348_v32 = vpack.c.bf16 %v2330_v27, %v2329_v3  ;;  %v2376_v27 = vunpack.c.h.bf16 %v3158_v45 }
 0x430   : > { %v2347_v50 = vpack.c.bf16 %v2328_v51, %v2327_v0 }
 0x432   : > { %3030 = vmatprep.mubr.bf16.mxu0 %v2347_v50 }
 0x433   : > { %3031 = vmatmul.mubr.bf16.gmra.mrb[40].mxu0 %v2348_v32 }
 0x435   : > { %v3008_v61 = vpop.f32.mrb[16].mxu0 }
 0x436   : > { %v2497_v63 = vadd.f32 %v3008_v61, %v5068_v21  ;;  %v2488_v16 = vpop.f32.mrb[17].mxu0 }
 0x437   : > { %v2489_v11 = vadd.f32 %v5068_v21, %v2488_v16  ;;  %v3009_v23 = vpop.f32.mrb[18].mxu0 }
 0x438   : > { %v2617_v35 = vadd.f32 %v2497_v63, %v2369_v49  ;;  %v2500_v7 = vadd.f32 %v3009_v23, %v5068_v21  ;;  %v2491_v4 = vpop.f32.mrb[19].mxu0 }
 0x439   : > { %v2615_v56 = vadd.f32 %v2489_v11, %v2367_v1  ;;  %v2492_v55 = vadd.f32 %v5068_v21, %v2491_v4 }
 0x43a   : > { %v2649_v17 = vmax.f32 %v2617_v35, 0.0  ;;  %v2618_v48 = vadd.f32 %v2500_v7, %v2370_v30 }
 0x43b   : > { %v2647_v39 = vmax.f32 %v2615_v56, 0.0  ;;  %v2616_v13 = vadd.f32 %v2492_v55, %v2368_v8  ;;  %v3159_v55 = vld [vmem:[%s3257_s12 + $0x38] sm:$0xff]  }
 0x43c   : > { %2681 = vst [vmem:[%s5079_s21 + $0x10] sm:$0xff] %v2649_v17  ;;  %v2650_v2 = vmax.f32 %v2618_v48, 0.0  ;;  %v2381_v17 = vunpack.c.l.bf16 %v3159_v55 }
 0x43d   : > { %2679 = vst [vmem:[%s5079_s21] sm:$0xff] %v2647_v39  ;;  %v2648_v26 = vmax.f32 %v2616_v13, 0.0  ;;  %v3012_v33 = vpop.f32.mrb[20].mxu0 }
 0x43e   : > { %2682 = vst [vmem:[%s5079_s21 + $0x18] sm:$0xff] %v2650_v2  ;;  %v2513_v24 = vadd.f32 %v3012_v33, %v5068_v21  ;;  %v2504_v12 = vpop.f32.mrb[21].mxu0  ;;  %v3160_v2 = vld [vmem:[%s3257_s12 + $0x30] sm:$0xff]   ;;  %v2382_v33 = vunpack.c.h.bf16 %v3159_v55 }
 0x43f   : > { %2680 = vst [vmem:[%s5079_s21 + $0x8] sm:$0xff] %v2648_v26  ;;  %v2505_v47 = vadd.f32 %v5068_v21, %v2504_v12  ;;  %v3013_v31 = vpop.f32.mrb[22].mxu0  ;;  %v2379_v19 = vunpack.c.l.bf16 %v3160_v2 }
 0x440   : > { %v2621_v25 = vadd.f32 %v2513_v24, %v2373_v59  ;;  %v2516_v46 = vadd.f32 %v3013_v31, %v5068_v21  ;;  %v2507_v37 = vpop.f32.mrb[23].mxu0  ;;  %v2380_v24 = vunpack.c.h.bf16 %v3160_v2 }
 0x441   : > { %v2619_v18 = vadd.f32 %v2505_v47, %v2371_v9  ;;  %v2508_v22 = vadd.f32 %v5068_v21, %v2507_v37 }
 0x442   : > { %v2653_v34 = vmax.f32 %v2621_v25, 0.0  ;;  %v2622_v53 = vadd.f32 %v2516_v46, %v2374_v60 }
 0x443   : > { %v2651_v6 = vmax.f32 %v2619_v18, 0.0  ;;  %v2620_v20 = vadd.f32 %v2508_v22, %v2372_v42 }
 0x444   : > { %2685 = vst [vmem:[%s5079_s21 + $0x30] sm:$0xff] %v2653_v34  ;;  %v2654_v41 = vmax.f32 %v2622_v53, 0.0  ;;  %v2988_v54 = vpop.f32.mrb[44].mxu1  ;;  %v3161_v53 = vld [vmem:[%s3257_s12 + $0x48] sm:$0xff]  }
 0x445   : > { %2683 = vst [vmem:[%s5079_s21 + $0x20] sm:$0xff] %v2651_v6  ;;  %v2652_v43 = vmax.f32 %v2620_v20, 0.0  ;;  %v3016_v14 = vpop.f32.mrb[24].mxu0  ;;  %v2297_v40 = vadd.f32 %v2988_v54, %v5018_v57  ;;  %v2288_v28 = vpop.f32.mrb[45].mxu1  ;;  %v2385_v6 = vunpack.c.l.bf16 %v3161_v53  ;;  %v3162_v20 = vld [vmem:[%s3257_s12 + $0x40] sm:$0xff]  }
 0x446   : > { %2686 = vst [vmem:[%s5079_s21 + $0x38] sm:$0xff] %v2654_v41  ;;  %v2529_v36 = vadd.f32 %v3016_v14, %v5068_v21  ;;  %v2520_v44 = vpop.f32.mrb[25].mxu0  ;;  %v2289_v51 = vadd.f32 %v5018_v57, %v2288_v28  ;;  %v2989_v50 = vpop.f32.mrb[46].mxu1  ;;  %v2383_v41 = vunpack.c.l.bf16 %v3162_v20  ;;  %v2386_v14 = vunpack.c.h.bf16 %v3161_v53 }
 0x447   : > { %2684 = vst [vmem:[%s5079_s21 + $0x28] sm:$0xff] %v2652_v43  ;;  %v2521_v5 = vadd.f32 %v5068_v21, %v2520_v44  ;;  %v3017_v3 = vpop.f32.mrb[26].mxu0  ;;  %v2300_v38 = vadd.f32 %v2989_v50, %v5018_v57  ;;  %v2291_v61 = vpop.f32.mrb[47].mxu1  ;;  %v2333_v8 = vmax.f32 %v2297_v40, 0.0  ;;  %v2384_v45 = vunpack.c.h.bf16 %v3162_v20  ;;  %v3163_v50 = vld [vmem:[%s3257_s12 + $0x58] sm:$0xff]  }
 0x448   : > { %v2625_v0 = vadd.f32 %v2529_v36, %v2377_v29  ;;  %v2532_v32 = vadd.f32 %v3017_v3, %v5068_v21  ;;  %v2523_v52 = vpop.f32.mrb[27].mxu0  ;;  %v2292_v30 = vadd.f32 %v5018_v57, %v2291_v61  ;;  %v2331_v7 = vmax.f32 %v2289_v51, 0.0 }
 0x449   : > { %v2623_v49 = vadd.f32 %v2521_v5, %v2375_v10  ;;  %v2524_v1 = vadd.f32 %v5068_v21, %v2523_v52  ;;  %v2334_v23 = vmax.f32 %v2300_v38, 0.0  ;;  %v2389_v52 = vunpack.c.l.bf16 %v3163_v50  ;;  %v3164_v38 = vld [vmem:[%s3257_s12 + $0x50] sm:$0xff]  }
 0x44a   : > { %v2657_v63 = vmax.f32 %v2625_v0, 0.0  ;;  %v2626_v16 = vadd.f32 %v2532_v32, %v2378_v62  ;;  %v2332_v56 = vmax.f32 %v2292_v30, 0.0 }
 0x44b   : > { %v2655_v11 = vmax.f32 %v2623_v49, 0.0  ;;  %v2624_v35 = vadd.f32 %v2524_v1, %v2376_v27  ;;  %v2350_v48 = vpack.c.bf16 %v2334_v23, %v2333_v8  ;;  %v2387_v1 = vunpack.c.l.bf16 %v3164_v38 }
 0x44c   : > { %2689 = vst [vmem:[%s5079_s21 + $0x50] sm:$0xff] %v2657_v63  ;;  %v2658_v4 = vmax.f32 %v2626_v16, 0.0  ;;  %v2349_v57 = vpack.c.bf16 %v2332_v56, %v2331_v7  ;;  %v2390_v16 = vunpack.c.h.bf16 %v3163_v50 }
 0x44d   : > { %2687 = vst [vmem:[%s5079_s21 + $0x40] sm:$0xff] %v2655_v11  ;;  %v2656_v39 = vmax.f32 %v2624_v35, 0.0  ;;  %v3020_v13 = vpop.f32.mrb[28].mxu0  ;;  %v2388_v11 = vunpack.c.h.bf16 %v3164_v38 }
 0x44e   : > { %2690 = vst [vmem:[%s5079_s21 + $0x58] sm:$0xff] %v2658_v4  ;;  %v2545_v59 = vadd.f32 %v3020_v13, %v5068_v21  ;;  %v2536_v26 = vpop.f32.mrb[29].mxu0  ;;  %3034 = vmatprep.mubr.bf16.mxu0 %v2349_v57 }
 0x44f   : > { %2688 = vst [vmem:[%s5079_s21 + $0x48] sm:$0xff] %v2656_v39  ;;  %v2537_v58 = vadd.f32 %v5068_v21, %v2536_v26  ;;  %v3021_v9 = vpop.f32.mrb[30].mxu0  ;;  %3035 = vmatmul.mubr.bf16.gmra.mrb[44].mxu0 %v2350_v48  ;;  %v3166_v26 = vld [vmem:[%s3257_s12 + $0x60] sm:$0xff]  }
 0x450   : > { %v2629_v12 = vadd.f32 %v2545_v59, %v2381_v17  ;;  %v2548_v60 = vadd.f32 %v3021_v9, %v5068_v21  ;;  %v2539_v47 = vpop.f32.mrb[31].mxu0 }
 0x451   : > { %v2627_v31 = vadd.f32 %v2537_v58, %v2379_v19  ;;  %v2540_v42 = vadd.f32 %v5068_v21, %v2539_v47  ;;  %v3165_v19 = vld [vmem:[%s3257_s12 + $0x68] sm:$0xff]   ;;  %v2392_v47 = vunpack.c.h.bf16 %v3166_v26 }
 0x452   : > { %v2661_v25 = vmax.f32 %v2629_v12, 0.0  ;;  %v2630_v46 = vadd.f32 %v2548_v60, %v2382_v33  ;;  %v2393_v57 = vunpack.c.l.bf16 %v3165_v19  ;;  %v2391_v33 = vunpack.c.l.bf16 %v3166_v26 }
 0x453   : > { %v2659_v37 = vmax.f32 %v2627_v31, 0.0  ;;  %v2628_v18 = vadd.f32 %v2540_v42, %v2380_v24  ;;  %v2394_v24 = vunpack.c.h.bf16 %v3165_v19 }
 0x454   : > { %2693 = vst [vmem:[%s5079_s21 + $0x70] sm:$0xff] %v2661_v25  ;;  %v2662_v22 = vmax.f32 %v2630_v46, 0.0 }
 0x455   : > { %2691 = vst [vmem:[%s5079_s21 + $0x60] sm:$0xff] %v2659_v37  ;;  %v2660_v34 = vmax.f32 %v2628_v18, 0.0 }
 0x456   : > { %2694 = vst [vmem:[%s5079_s21 + $0x78] sm:$0xff] %v2662_v22 }
 0x457   : > { %2692 = vst [vmem:[%s5079_s21 + $0x68] sm:$0xff] %v2660_v34 }
 0x486   : > { %v3024_v15 = vpop.f32.mrb[32].mxu0 }
 0x487   : > { %v2561_v29 = vadd.f32 %v3024_v15, %v5068_v21  ;;  %v2552_v43 = vpop.f32.mrb[33].mxu0 }
 0x488   : > { %v2553_v10 = vadd.f32 %v5068_v21, %v2552_v43  ;;  %v3025_v36 = vpop.f32.mrb[34].mxu0  ;;  %v3168_v43 = vld [vmem:[%s3257_s12 + $0x70] sm:$0xff]  }
 0x489   : > { %v2633_v54 = vadd.f32 %v2561_v29, %v2385_v6  ;;  %v2564_v44 = vadd.f32 %v3025_v36, %v5068_v21  ;;  %v2555_v62 = vpop.f32.mrb[35].mxu0 }
 0x48a   : > { %v2631_v40 = vadd.f32 %v2553_v10, %v2383_v41  ;;  %v2556_v5 = vadd.f32 %v5068_v21, %v2555_v62  ;;  %v3167_v41 = vld [vmem:[%s3257_s12 + $0x78] sm:$0xff]   ;;  %v2396_v62 = vunpack.c.h.bf16 %v3168_v43 }
 0x48b   : > { %v2665_v28 = vmax.f32 %v2633_v54, 0.0  ;;  %v2634_v3 = vadd.f32 %v2564_v44, %v2386_v14  ;;  %v2397_v15 = vunpack.c.l.bf16 %v3167_v41  ;;  %v2395_v14 = vunpack.c.l.bf16 %v3168_v43 }
 0x48c   : > { %v2663_v27 = vmax.f32 %v2631_v40, 0.0  ;;  %v2632_v0 = vadd.f32 %v2556_v5, %v2384_v45  ;;  %v2398_v36 = vunpack.c.h.bf16 %v3167_v41 }
 0x48d   : > { %2697 = vst [vmem:[%s5079_s21 + $0x90] sm:$0xff] %v2665_v28  ;;  %v2666_v51 = vmax.f32 %v2634_v3, 0.0 }
 0x48e   : > { %2695 = vst [vmem:[%s5079_s21 + $0x80] sm:$0xff] %v2663_v27  ;;  %v2664_v32 = vmax.f32 %v2632_v0, 0.0 }
 0x48f   : > { %2698 = vst [vmem:[%s5079_s21 + $0x98] sm:$0xff] %v2666_v51 }
 0x490   : > { %2696 = vst [vmem:[%s5079_s21 + $0x88] sm:$0xff] %v2664_v32 }
 0x4c6   : > { %v3028_v49 = vpop.f32.mrb[36].mxu0 }
 0x4c7   : > { %v2577_v61 = vadd.f32 %v3028_v49, %v5068_v21  ;;  %v2568_v63 = vpop.f32.mrb[37].mxu0 }
 0x4c8   : > { %v2569_v30 = vadd.f32 %v5068_v21, %v2568_v63  ;;  %v3029_v8 = vpop.f32.mrb[38].mxu0 }
 0x4c9   : > { %v2637_v23 = vadd.f32 %v2577_v61, %v2389_v52  ;;  %v2580_v35 = vadd.f32 %v3029_v8, %v5068_v21  ;;  %v2571_v7 = vpop.f32.mrb[39].mxu0 }
 0x4ca   : > { %v2635_v4 = vadd.f32 %v2569_v30, %v2387_v1  ;;  %v2572_v56 = vadd.f32 %v5068_v21, %v2571_v7 }
 0x4cb   : > { %v2669_v55 = vmax.f32 %v2637_v23, 0.0  ;;  %v2638_v17 = vadd.f32 %v2580_v35, %v2390_v16 }
 0x4cc   : > { %v2667_v48 = vmax.f32 %v2635_v4, 0.0  ;;  %v2636_v39 = vadd.f32 %v2572_v56, %v2388_v11 }
 0x4cd   : > { %2701 = vst [vmem:[%s5079_s21 + $0xb0] sm:$0xff] %v2669_v55  ;;  %v2670_v13 = vmax.f32 %v2638_v17, 0.0 }
 0x4ce   : > { %2699 = vst [vmem:[%s5079_s21 + $0xa0] sm:$0xff] %v2667_v48  ;;  %v2668_v2 = vmax.f32 %v2636_v39, 0.0 }
 0x4cf   : > { %2702 = vst [vmem:[%s5079_s21 + $0xb8] sm:$0xff] %v2670_v13 }
 0x4d0   : > { %2700 = vst [vmem:[%s5079_s21 + $0xa8] sm:$0xff] %v2668_v2 }
 0x506   : > { %v3032_v59 = vpop.f32.mrb[40].mxu0 }
 0x507   : > { %v2593_v58 = vadd.f32 %v3032_v59, %v5068_v21  ;;  %v2584_v9 = vpop.f32.mrb[41].mxu0 }
 0x508   : > { %v2585_v12 = vadd.f32 %v5068_v21, %v2584_v9  ;;  %v3033_v60 = vpop.f32.mrb[42].mxu0 }
 0x509   : > { %v2641_v31 = vadd.f32 %v2593_v58, %v2393_v57  ;;  %v2596_v42 = vadd.f32 %v3033_v60, %v5068_v21  ;;  %v2587_v25 = vpop.f32.mrb[43].mxu0 }
 0x50a   : > { %v2639_v46 = vadd.f32 %v2585_v12, %v2391_v33  ;;  %v2588_v37 = vadd.f32 %v5068_v21, %v2587_v25 }
 0x50b   : > { %v2673_v18 = vmax.f32 %v2641_v31, 0.0  ;;  %v2642_v22 = vadd.f32 %v2596_v42, %v2394_v24 }
 0x50c   : > { %v2671_v34 = vmax.f32 %v2639_v46, 0.0  ;;  %v2640_v53 = vadd.f32 %v2588_v37, %v2392_v47 }
 0x50d   : > { %2705 = vst [vmem:[%s5079_s21 + $0xd0] sm:$0xff] %v2673_v18  ;;  %v2674_v6 = vmax.f32 %v2642_v22, 0.0 }
 0x50e   : > { %2703 = vst [vmem:[%s5079_s21 + $0xc0] sm:$0xff] %v2671_v34  ;;  %v2672_v20 = vmax.f32 %v2640_v53, 0.0 }
 0x50f   : > { %2706 = vst [vmem:[%s5079_s21 + $0xd8] sm:$0xff] %v2674_v6 }
 0x510   : > { %2704 = vst [vmem:[%s5079_s21 + $0xc8] sm:$0xff] %v2672_v20 }
 0x522   : > { %v3036_v29 = vpop.f32.mrb[44].mxu0 }
 0x523   : > { %v2609_v45 = vadd.f32 %v3036_v29, %v5068_v21  ;;  %v2600_v10 = vpop.f32.mrb[45].mxu0 }
 0x524   : > { %v2601_v54 = vadd.f32 %v5068_v21, %v2600_v10  ;;  %v3037_v44 = vpop.f32.mrb[46].mxu0 }
 0x525   : > { %v2645_v40 = vadd.f32 %v2609_v45, %v2397_v15  ;;  %v2612_v5 = vadd.f32 %v3037_v44, %v5068_v21  ;;  %v2603_v28 = vpop.f32.mrb[47].mxu0 }
 0x526   : > { %v2643_v3 = vadd.f32 %v2601_v54, %v2395_v14  ;;  %v2604_v27 = vadd.f32 %v5068_v21, %v2603_v28 }
 0x527   : > { %v2677_v0 = vmax.f32 %v2645_v40, 0.0  ;;  %v2646_v51 = vadd.f32 %v2612_v5, %v2398_v36 }
 0x528   : > { %v2675_v32 = vmax.f32 %v2643_v3, 0.0  ;;  %v2644_v50 = vadd.f32 %v2604_v27, %v2396_v62 }
 0x529   : > { %2709 = vst [vmem:[%s5079_s21 + $0xf0] sm:$0xff] %v2677_v0  ;;  %v2678_v52 = vmax.f32 %v2646_v51, 0.0 }
 0x52a   : > { %2707 = vst [vmem:[%s5079_s21 + $0xe0] sm:$0xff] %v2675_v32  ;;  %v2676_v49 = vmax.f32 %v2644_v50, 0.0 }
 0x52b   : > { %2710 = vst [vmem:[%s5079_s21 + $0xf8] sm:$0xff] %v2678_v52 }
 0x52c   : > { %2708 = vst [vmem:[%s5079_s21 + $0xe8] sm:$0xff] %v2676_v49 }
 0x52d PF: > { %s17_s24 = sadd.s32 1, %s3183_s24  }
 0x52e   : > { %p14_p4 = scmp.ge.s32.totalorder %s17_s24, 4  }
 0x530   :  { %16 = sbr.rel (!%p14_p4) target bundleno = 1 (0x1), region = 78 }

</bundles_post_ra>
